<compile_context>
chip_gen: v6e
topology: v6e:2x2x1
jax: 0.10.0
libtpu: 0.0.40
codegen_flags: <defaults>
</compile_context>

<pallas_src>
import functools

import jax
import jax.numpy as jnp
from jax.experimental import pallas as pl
from jax.experimental.pallas import tpu as pltpu


def _round_up(v, m):
    return (v + m - 1) // m * m


def _lstm_kernel(x_ref, w_ih_ref, w_hh_ref, b_ref, h_out_ref, c_out_ref,
                 xw_scr, h_scr, c_scr, *, t_block, hidden_pad):
    t_idx = pl.program_id(1)

    # Reset carried state at the start of every sequence sweep (h0 = c0 = 0).
    @pl.when(t_idx == 0)
    def _():
        h_scr[...] = jnp.zeros_like(h_scr)
        c_scr[...] = jnp.zeros_like(c_scr)

    tb, bsz, isz = x_ref.shape
    four_h = w_ih_ref.shape[1]

    # Input contribution for the whole time chunk in ONE big MXU matmul
    # (independent of the recurrence). Reshape is a layout no-op (bsz % 8 == 0,
    # isz % 128 == 0). Bias added once per chunk.
    x2d = x_ref[...].reshape(tb * bsz, isz)                       # bf16
    xw = jnp.dot(x2d, w_ih_ref[...],
                 preferred_element_type=jnp.float32) + b_ref[...]  # f32
    xw_scr[...] = xw.reshape(tb, bsz, four_h)

    w_hh = w_hh_ref[...]            # (H_pad, 4*H_pad) bf16, resident for the chunk
    H = hidden_pad

    def step(i, carry):
        del carry
        h_prev = h_scr[...]          # (B, H_pad) bf16
        c_prev = c_scr[...]          # (B, H_pad) f32
        # Per-step critical path: one small recurrent matmul + VPU/EUP elementwise.
        gates = xw_scr[i] + jnp.dot(h_prev, w_hh,
                                    preferred_element_type=jnp.float32)
        i_g = jax.nn.sigmoid(gates[:, 0 * H:1 * H])
        f_g = jax.nn.sigmoid(gates[:, 1 * H:2 * H])
        g_g = jnp.tanh(gates[:, 2 * H:3 * H])
        o_g = jax.nn.sigmoid(gates[:, 3 * H:4 * H])
        c_new = f_g * c_prev + i_g * g_g
        h_new = o_g * jnp.tanh(c_new)
        h_scr[...] = h_new.astype(h_scr.dtype)
        c_scr[...] = c_new
        h_out_ref[i] = h_new.astype(h_out_ref.dtype)
        c_out_ref[i] = c_new.astype(c_out_ref.dtype)
        return 0

    jax.lax.fori_loop(0, t_block, step, 0, unroll=True)


def lstm_forward(x, w_ih, w_hh, b_ih, b_hh, *, t_block=8, batch_block=None):
    """x: (batch, seq, input). Weights follow torch.nn.LSTMCell layout:
       w_ih: (4H, I), w_hh: (4H, H), b_ih/b_hh: (4H,). Returns (H, C), each
       (batch, seq, hidden) float32."""
    batch, seq_len, input_size = x.shape
    hidden_size = w_hh.shape[1]
    f32 = jnp.float32

    # --- Padded, hardware-aligned sizes. Zero padding is exact for LSTM:
    #     padded hidden lanes keep h = c = 0 for all t.
    i_pad = _round_up(input_size, 128)
    h_pad = _round_up(hidden_size, 128)
    four_h_pad = 4 * h_pad
    t_block = max(1, min(t_block, seq_len))
    s_pad = _round_up(seq_len, t_block)

    b_pad = _round_up(batch, 8)
    if batch_block is None:
        batch_block = min(b_pad, 256)          # >1 block enables megacore sharding
    batch_block = min(_round_up(batch_block, 8), b_pad)
    b_pad = _round_up(b_pad, batch_block)
    n_b = b_pad // batch_block
    n_t = s_pad // t_block

    def pad_gate_cols(w):        # (rows, 4H) -> (rows, 4*h_pad), per-gate column pad
        rows = w.shape[0]
        w = w.reshape(rows, 4, hidden_size)
        w = jnp.pad(w, ((0, 0), (0, 0), (0, h_pad - hidden_size)))
        return w.reshape(rows, four_h_pad)

    # Weight prep: transpose to x@W layout, per-gate pad, cast to bf16 for the MXU.
    w_ih_t = pad_gate_cols(jnp.asarray(w_ih, f32).T)                     # (I, 4*h_pad)
    w_ih_t = jnp.pad(w_ih_t, ((0, i_pad - input_size), (0, 0))).astype(jnp.bfloat16)
    w_hh_t = pad_gate_cols(jnp.asarray(w_hh, f32).T)                     # (H, 4*h_pad)
    w_hh_t = jnp.pad(w_hh_t, ((0, h_pad - hidden_size), (0, 0))).astype(jnp.bfloat16)
    bias = (jnp.asarray(b_ih, f32) + jnp.asarray(b_hh, f32)).reshape(1, 4 * hidden_size)
    bias = pad_gate_cols(bias)                                           # (1, 4*h_pad) f32

    # Time-major, padded, bf16 input.
    x_p = jnp.pad(jnp.asarray(x, f32),
                  ((0, b_pad - batch), (0, s_pad - seq_len), (0, i_pad - input_size)))
    x_tm = jnp.transpose(x_p, (1, 0, 2)).astype(jnp.bfloat16)            # (S, B, I)

    kernel = functools.partial(_lstm_kernel, t_block=t_block, hidden_pad=h_pad)

    h_tm, c_tm = pl.pallas_call(
        kernel,
        out_shape=(
            jax.ShapeDtypeStruct((s_pad, b_pad, h_pad), f32),
            jax.ShapeDtypeStruct((s_pad, b_pad, h_pad), f32),
        ),
        grid_spec=pltpu.PrefetchScalarGridSpec(
            num_scalar_prefetch=0,
            grid=(n_b, n_t),
            in_specs=[
                pl.BlockSpec((t_block, batch_block, i_pad), lambda b, t: (t, b, 0)),
                pl.BlockSpec((i_pad, four_h_pad), lambda b, t: (0, 0)),
                pl.BlockSpec((h_pad, four_h_pad), lambda b, t: (0, 0)),
                pl.BlockSpec((1, four_h_pad), lambda b, t: (0, 0)),
            ],
            out_specs=[
                pl.BlockSpec((t_block, batch_block, h_pad), lambda b, t: (t, b, 0)),
                pl.BlockSpec((t_block, batch_block, h_pad), lambda b, t: (t, b, 0)),
            ],
            scratch_shapes=[
                pltpu.VMEM((t_block, batch_block, four_h_pad), jnp.float32),  # x@W_ih+b
                pltpu.VMEM((batch_block, h_pad), jnp.bfloat16),               # h carry
                pltpu.VMEM((batch_block, h_pad), jnp.float32),                # c carry
            ],
        ),
        compiler_params=pltpu.CompilerParams(
            # time carries the recurrence -> sequential; batch blocks are independent.
            dimension_semantics=("parallel", "arbitrary"),
        ),
    )(x_tm, w_ih_t, w_hh_t, bias)

    # Back to PyTorch convention (batch, seq, hidden); strip padding.
    h_out = jnp.transpose(h_tm[:seq_len, :batch, :hidden_size], (1, 0, 2))
    c_out = jnp.transpose(c_tm[:seq_len, :batch, :hidden_size], (1, 0, 2))
    return h_out, c_out


def _lstm_reference(x, w_ih, w_hh, b_ih, b_hh):
    """Pure-JAX f32 reference mirroring torch.nn.LSTMCell unrolled over time."""
    hidden_size = w_hh.shape[1]

    def step(carry, x_t):
        h, c = carry
        gates = x_t @ w_ih.T + b_ih + h @ w_hh.T + b_hh
        i, f, g, o = jnp.split(gates, 4, axis=-1)
        i, f, o = jax.nn.sigmoid(i), jax.nn.sigmoid(f), jax.nn.sigmoid(o)
        g = jnp.tanh(g)
        c_new = f * c + i * g
        h_new = o * jnp.tanh(c_new)
        return (h_new, c_new), (h_new, c_new)

    batch = x.shape[0]
    h0 = jnp.zeros((batch, hidden_size), jnp.float32)
    c0 = jnp.zeros((batch, hidden_size), jnp.float32)
    _, (H, C) = jax.lax.scan(step, (h0, c0), jnp.transpose(x, (1, 0, 2)))
    return jnp.transpose(H, (1, 0, 2)), jnp.transpose(C, (1, 0, 2))


if __name__ == "__main__":
    # Small shapes; seq_len=12 with t_block=8 exercises both the in-kernel time
    # chunking (carry across grid steps) and the time-padding path.
    batch, seq_len, input_size, hidden_size = 8, 12, 16, 32

    key = jax.random.PRNGKey(0)
    kx, k1, k2, k3, k4 = jax.random.split(key, 5)

    x = jax.random.normal(kx, (batch, seq_len, input_size), jnp.float32)
    w_ih = jax.random.uniform(k1, (4 * hidden_size, input_size), jnp.float32, -0.1, 0.1)
    w_hh = jax.random.uniform(k2, (4 * hidden_size, hidden_size), jnp.float32, -0.1, 0.1)
    b_ih = jax.random.uniform(k3, (4 * hidden_size,), jnp.float32, -0.05, 0.05)
    b_hh = jax.random.uniform(k4, (4 * hidden_size,), jnp.float32, -0.05, 0.05)

    H, C = lstm_forward(x, w_ih, w_hh, b_ih, b_hh)
    H, C = jax.block_until_ready((H, C))

    H_ref, C_ref = _lstm_reference(x, w_ih, w_hh, b_ih, b_hh)
    assert H.shape == (batch, seq_len, hidden_size)
    assert C.shape == (batch, seq_len, hidden_size)
    # bf16 matmul operands (f32 accumulation / f32 cell state) -> loosened tolerance.
    assert jnp.allclose(H, H_ref, atol=2e-2, rtol=2e-2)
    assert jnp.allclose(C, C_ref, atol=2e-2, rtol=2e-2)

    # TODO(synk): recurrent (Gal) dropout only applies in training with rdrop>0 (eval
    # forward implemented); bidirectional variant = same kernel on time-reversed input
    # + concat in the wrapper.
    print("KERNEL_OK")
</pallas_src>

<mosaic_0001>
module attributes {stable_mosaic.version = 11 : i64} {
  func.func @_lstm_kernel(%arg0: i32, %arg1: i32, %arg2: memref<8x8x128xbf16, #tpu.memory_space<vmem>>, %arg3: memref<128x512xbf16, #tpu.memory_space<vmem>>, %arg4: memref<128x512xbf16, #tpu.memory_space<vmem>>, %arg5: memref<1x512xf32, #tpu.memory_space<vmem>>, %arg6: memref<8x8x128xf32, #tpu.memory_space<vmem>>, %arg7: memref<8x8x128xf32, #tpu.memory_space<vmem>>, %arg8: memref<8x8x512xf32, #tpu.memory_space<vmem>>, %arg9: memref<8x128xbf16, #tpu.memory_space<vmem>>, %arg10: memref<8x128xf32, #tpu.memory_space<vmem>>) attributes {dimension_semantics = [#tpu.dimension_semantics<parallel>, #tpu.dimension_semantics<arbitrary>], iteration_bounds = array<i64: 1, 2>, scalar_prefetch = 0 : i64, scratch_operands = 3 : i64, tpu.core_type = #tpu.core_type<tc>, window_params = [{transform_indices = @transform_0, window_bounds = array<i64: 8, 8, 128>}, {pipeline_mode = #tpu.pipeline_mode<synchronous>, transform_indices = @transform_1, window_bounds = array<i64: 128, 512>}, {pipeline_mode = #tpu.pipeline_mode<synchronous>, transform_indices = @transform_2, window_bounds = array<i64: 128, 512>}, {pipeline_mode = #tpu.pipeline_mode<synchronous>, transform_indices = @transform_3, window_bounds = array<i64: 1, 512>}, {transform_indices = @transform_4, window_bounds = array<i64: 8, 8, 128>}, {transform_indices = @transform_5, window_bounds = array<i64: 8, 8, 128>}]} {
    %c0_i32 = arith.constant 0 : i32
    %0 = arith.cmpi eq, %arg1, %c0_i32 : i32
    %1 = arith.extui %0 : i1 to i32
    %c0_i32_0 = arith.constant 0 : i32
    %2 = arith.cmpi ne, %1, %c0_i32_0 : i32
    scf.if %2 {
      %cst_157 = arith.constant 0.000000e+00 : bf16
      %357 = vector.broadcast %cst_157 : bf16 to vector<8x128xbf16>
      %c0_158 = arith.constant 0 : index
      %c0_159 = arith.constant 0 : index
      %358 = vector.load %arg9[%c0_158, %c0_159] : memref<8x128xbf16, #tpu.memory_space<vmem>>, vector<8x128xbf16>
      tpu.vector_store %arg9[%c0_158, %c0_159], %357 {strides = array<i32>} : memref<8x128xbf16, #tpu.memory_space<vmem>>, vector<8x128xbf16>,
      %cst_160 = arith.constant 0.000000e+00 : f32
      %359 = vector.broadcast %cst_160 : f32 to vector<8x128xf32>
      %c0_161 = arith.constant 0 : index
      %c0_162 = arith.constant 0 : index
      %360 = vector.load %arg10[%c0_161, %c0_162] : memref<8x128xf32, #tpu.memory_space<vmem>>, vector<8x128xf32>
      tpu.vector_store %arg10[%c0_161, %c0_162], %359 {strides = array<i32>} : memref<8x128xf32, #tpu.memory_space<vmem>>, vector<8x128xf32>,
    } else {
    }
    %c0 = arith.constant 0 : index
    %c0_1 = arith.constant 0 : index
    %c0_2 = arith.constant 0 : index
    %3 = vector.load %arg2[%c0, %c0_1, %c0_2] : memref<8x8x128xbf16, #tpu.memory_space<vmem>>, vector<8x8x128xbf16>
    %4 = vector.shape_cast %3 : vector<8x8x128xbf16> to vector<64x128xbf16>
    %c0_3 = arith.constant 0 : index
    %c0_4 = arith.constant 0 : index
    %5 = vector.load %arg3[%c0_3, %c0_4] : memref<128x512xbf16, #tpu.memory_space<vmem>>, vector<128x512xbf16>
    %cst = arith.constant dense<0.000000e+00> : vector<64x512xf32>
    %6 = tpu.matmul %4, %5, %cst {dimension_numbers = #tpu.dot_dimension_numbers<[1], [0], [0], [1], [0, 0, 1, 1], [], []>} : vector<64x128xbf16>, vector<128x512xbf16>, vector<64x512xf32> -> vector<64x512xf32>
    %c0_5 = arith.constant 0 : index
    %c0_6 = arith.constant 0 : index
    %7 = vector.load %arg5[%c0_5, %c0_6] : memref<1x512xf32, #tpu.memory_space<vmem>>, vector<1x512xf32>
    %8 = vector.broadcast %7 : vector<1x512xf32> to vector<64x512xf32>
    %9 = arith.addf %6, %8 : vector<64x512xf32>
    %10 = vector.shape_cast %9 : vector<64x512xf32> to vector<8x8x512xf32>
    %c0_7 = arith.constant 0 : index
    %c0_8 = arith.constant 0 : index
    %c0_9 = arith.constant 0 : index
    %11 = vector.load %arg8[%c0_7, %c0_8, %c0_9] : memref<8x8x512xf32, #tpu.memory_space<vmem>>, vector<8x8x512xf32>
    tpu.vector_store %arg8[%c0_7, %c0_8, %c0_9], %10 {strides = array<i32>} : memref<8x8x512xf32, #tpu.memory_space<vmem>>, vector<8x8x512xf32>,
    %c0_10 = arith.constant 0 : index
    %c0_11 = arith.constant 0 : index
    %12 = vector.load %arg4[%c0_10, %c0_11] : memref<128x512xbf16, #tpu.memory_space<vmem>>, vector<128x512xbf16>
    %c0_i32_12 = arith.constant 0 : i32
    %c0_13 = arith.constant 0 : index
    %c0_14 = arith.constant 0 : index
    %13 = vector.load %arg9[%c0_13, %c0_14] : memref<8x128xbf16, #tpu.memory_space<vmem>>, vector<8x128xbf16>
    %c0_15 = arith.constant 0 : index
    %c0_16 = arith.constant 0 : index
    %14 = vector.load %arg10[%c0_15, %c0_16] : memref<8x128xf32, #tpu.memory_space<vmem>>, vector<8x128xf32>
    %15 = arith.index_cast %c0_i32_12 : i32 to index
    %c0_17 = arith.constant 0 : index
    %c0_18 = arith.constant 0 : index
    %16 = vector.load %arg8[%15, %c0_17, %c0_18] : memref<8x8x512xf32, #tpu.memory_space<vmem>>, vector<1x8x512xf32>
    %17 = vector.shape_cast %16 : vector<1x8x512xf32> to vector<8x512xf32>
    %cst_19 = arith.constant dense<0.000000e+00> : vector<8x512xf32>
    %18 = tpu.matmul %13, %12, %cst_19 {dimension_numbers = #tpu.dot_dimension_numbers<[1], [0], [0], [1], [0, 0, 1, 1], [], []>} : vector<8x128xbf16>, vector<128x512xbf16>, vector<8x512xf32> -> vector<8x512xf32>
    %19 = arith.addf %17, %18 : vector<8x512xf32>
    %20 = vector.extract_strided_slice %19 {offsets = [0, 0], sizes = [8, 128], strides = [1, 1]} : vector<8x512xf32> to vector<8x128xf32>
    %21 = arith.negf %20 : vector<8x128xf32>
    %22 = math.exp %21 : vector<8x128xf32>
    %cst_20 = arith.constant 1.000000e+00 : f32
    %23 = vector.broadcast %cst_20 : f32 to vector<8x128xf32>
    %24 = arith.addf %23, %22 : vector<8x128xf32>
    %25 = arith.divf %23, %24 : vector<8x128xf32>
    %26 = vector.extract_strided_slice %19 {offsets = [0, 128], sizes = [8, 128], strides = [1, 1]} : vector<8x512xf32> to vector<8x128xf32>
    %27 = arith.negf %26 : vector<8x128xf32>
    %28 = math.exp %27 : vector<8x128xf32>
    %cst_21 = arith.constant 1.000000e+00 : f32
    %29 = vector.broadcast %cst_21 : f32 to vector<8x128xf32>
    %30 = arith.addf %29, %28 : vector<8x128xf32>
    %31 = arith.divf %29, %30 : vector<8x128xf32>
    %32 = vector.extract_strided_slice %19 {offsets = [0, 256], sizes = [8, 128], strides = [1, 1]} : vector<8x512xf32> to vector<8x128xf32>
    %33 = math.tanh %32 : vector<8x128xf32>
    %34 = vector.extract_strided_slice %19 {offsets = [0, 384], sizes = [8, 128], strides = [1, 1]} : vector<8x512xf32> to vector<8x128xf32>
    %35 = arith.negf %34 : vector<8x128xf32>
    %36 = math.exp %35 : vector<8x128xf32>
    %cst_22 = arith.constant 1.000000e+00 : f32
    %37 = vector.broadcast %cst_22 : f32 to vector<8x128xf32>
    %38 = arith.addf %37, %36 : vector<8x128xf32>
    %39 = arith.divf %37, %38 : vector<8x128xf32>
    %40 = arith.mulf %31, %14 : vector<8x128xf32>
    %41 = arith.mulf %25, %33 : vector<8x128xf32>
    %42 = arith.addf %40, %41 : vector<8x128xf32>
    %43 = math.tanh %42 : vector<8x128xf32>
    %44 = arith.mulf %39, %43 : vector<8x128xf32>
    %45 = arith.truncf %44 : vector<8x128xf32> to vector<8x128xbf16>
    %c0_23 = arith.constant 0 : index
    %c0_24 = arith.constant 0 : index
    %46 = vector.load %arg9[%c0_23, %c0_24] : memref<8x128xbf16, #tpu.memory_space<vmem>>, vector<8x128xbf16>
    tpu.vector_store %arg9[%c0_23, %c0_24], %45 {strides = array<i32>} : memref<8x128xbf16, #tpu.memory_space<vmem>>, vector<8x128xbf16>,
    %c0_25 = arith.constant 0 : index
    %c0_26 = arith.constant 0 : index
    %47 = vector.load %arg10[%c0_25, %c0_26] : memref<8x128xf32, #tpu.memory_space<vmem>>, vector<8x128xf32>
    tpu.vector_store %arg10[%c0_25, %c0_26], %42 {strides = array<i32>} : memref<8x128xf32, #tpu.memory_space<vmem>>, vector<8x128xf32>,
    %48 = arith.index_cast %c0_i32_12 : i32 to index
    %c0_27 = arith.constant 0 : index
    %c0_28 = arith.constant 0 : index
    %49 = vector.load %arg6[%48, %c0_27, %c0_28] : memref<8x8x128xf32, #tpu.memory_space<vmem>>, vector<1x8x128xf32>
    %50 = vector.shape_cast %49 : vector<1x8x128xf32> to vector<8x128xf32>
    %51 = vector.shape_cast %44 : vector<8x128xf32> to vector<1x8x128xf32>
    tpu.vector_store %arg6[%48, %c0_27, %c0_28], %51 {strides = array<i32>} : memref<8x8x128xf32, #tpu.memory_space<vmem>>, vector<1x8x128xf32>,
    %52 = arith.index_cast %c0_i32_12 : i32 to index
    %c0_29 = arith.constant 0 : index
    %c0_30 = arith.constant 0 : index
    %53 = vector.load %arg7[%52, %c0_29, %c0_30] : memref<8x8x128xf32, #tpu.memory_space<vmem>>, vector<1x8x128xf32>
    %54 = vector.shape_cast %53 : vector<1x8x128xf32> to vector<8x128xf32>
    %55 = vector.shape_cast %42 : vector<8x128xf32> to vector<1x8x128xf32>
    tpu.vector_store %arg7[%52, %c0_29, %c0_30], %55 {strides = array<i32>} : memref<8x8x128xf32, #tpu.memory_space<vmem>>, vector<1x8x128xf32>,
    %c1_i32 = arith.constant 1 : i32
    %c0_31 = arith.constant 0 : index
    %c0_32 = arith.constant 0 : index
    %56 = vector.load %arg9[%c0_31, %c0_32] : memref<8x128xbf16, #tpu.memory_space<vmem>>, vector<8x128xbf16>
    %c0_33 = arith.constant 0 : index
    %c0_34 = arith.constant 0 : index
    %57 = vector.load %arg10[%c0_33, %c0_34] : memref<8x128xf32, #tpu.memory_space<vmem>>, vector<8x128xf32>
    %58 = arith.index_cast %c1_i32 : i32 to index
    %c0_35 = arith.constant 0 : index
    %c0_36 = arith.constant 0 : index
    %59 = vector.load %arg8[%58, %c0_35, %c0_36] : memref<8x8x512xf32, #tpu.memory_space<vmem>>, vector<1x8x512xf32>
    %60 = vector.shape_cast %59 : vector<1x8x512xf32> to vector<8x512xf32>
    %cst_37 = arith.constant dense<0.000000e+00> : vector<8x512xf32>
    %61 = tpu.matmul %56, %12, %cst_37 {dimension_numbers = #tpu.dot_dimension_numbers<[1], [0], [0], [1], [0, 0, 1, 1], [], []>} : vector<8x128xbf16>, vector<128x512xbf16>, vector<8x512xf32> -> vector<8x512xf32>
    %62 = arith.addf %60, %61 : vector<8x512xf32>
    %63 = vector.extract_strided_slice %62 {offsets = [0, 0], sizes = [8, 128], strides = [1, 1]} : vector<8x512xf32> to vector<8x128xf32>
    %64 = arith.negf %63 : vector<8x128xf32>
    %65 = math.exp %64 : vector<8x128xf32>
    %cst_38 = arith.constant 1.000000e+00 : f32
    %66 = vector.broadcast %cst_38 : f32 to vector<8x128xf32>
    %67 = arith.addf %66, %65 : vector<8x128xf32>
    %68 = arith.divf %66, %67 : vector<8x128xf32>
    %69 = vector.extract_strided_slice %62 {offsets = [0, 128], sizes = [8, 128], strides = [1, 1]} : vector<8x512xf32> to vector<8x128xf32>
    %70 = arith.negf %69 : vector<8x128xf32>
    %71 = math.exp %70 : vector<8x128xf32>
    %cst_39 = arith.constant 1.000000e+00 : f32
    %72 = vector.broadcast %cst_39 : f32 to vector<8x128xf32>
    %73 = arith.addf %72, %71 : vector<8x128xf32>
    %74 = arith.divf %72, %73 : vector<8x128xf32>
    %75 = vector.extract_strided_slice %62 {offsets = [0, 256], sizes = [8, 128], strides = [1, 1]} : vector<8x512xf32> to vector<8x128xf32>
    %76 = math.tanh %75 : vector<8x128xf32>
    %77 = vector.extract_strided_slice %62 {offsets = [0, 384], sizes = [8, 128], strides = [1, 1]} : vector<8x512xf32> to vector<8x128xf32>
    %78 = arith.negf %77 : vector<8x128xf32>
    %79 = math.exp %78 : vector<8x128xf32>
    %cst_40 = arith.constant 1.000000e+00 : f32
    %80 = vector.broadcast %cst_40 : f32 to vector<8x128xf32>
    %81 = arith.addf %80, %79 : vector<8x128xf32>
    %82 = arith.divf %80, %81 : vector<8x128xf32>
    %83 = arith.mulf %74, %57 : vector<8x128xf32>
    %84 = arith.mulf %68, %76 : vector<8x128xf32>
    %85 = arith.addf %83, %84 : vector<8x128xf32>
    %86 = math.tanh %85 : vector<8x128xf32>
    %87 = arith.mulf %82, %86 : vector<8x128xf32>
    %88 = arith.truncf %87 : vector<8x128xf32> to vector<8x128xbf16>
    %c0_41 = arith.constant 0 : index
    %c0_42 = arith.constant 0 : index
    %89 = vector.load %arg9[%c0_41, %c0_42] : memref<8x128xbf16, #tpu.memory_space<vmem>>, vector<8x128xbf16>
    tpu.vector_store %arg9[%c0_41, %c0_42], %88 {strides = array<i32>} : memref<8x128xbf16, #tpu.memory_space<vmem>>, vector<8x128xbf16>,
    %c0_43 = arith.constant 0 : index
    %c0_44 = arith.constant 0 : index
    %90 = vector.load %arg10[%c0_43, %c0_44] : memref<8x128xf32, #tpu.memory_space<vmem>>, vector<8x128xf32>
    tpu.vector_store %arg10[%c0_43, %c0_44], %85 {strides = array<i32>} : memref<8x128xf32, #tpu.memory_space<vmem>>, vector<8x128xf32>,
    %91 = arith.index_cast %c1_i32 : i32 to index
    %c0_45 = arith.constant 0 : index
    %c0_46 = arith.constant 0 : index
    %92 = vector.load %arg6[%91, %c0_45, %c0_46] : memref<8x8x128xf32, #tpu.memory_space<vmem>>, vector<1x8x128xf32>
    %93 = vector.shape_cast %92 : vector<1x8x128xf32> to vector<8x128xf32>
    %94 = vector.shape_cast %87 : vector<8x128xf32> to vector<1x8x128xf32>
    tpu.vector_store %arg6[%91, %c0_45, %c0_46], %94 {strides = array<i32>} : memref<8x8x128xf32, #tpu.memory_space<vmem>>, vector<1x8x128xf32>,
    %95 = arith.index_cast %c1_i32 : i32 to index
    %c0_47 = arith.constant 0 : index
    %c0_48 = arith.constant 0 : index
    %96 = vector.load %arg7[%95, %c0_47, %c0_48] : memref<8x8x128xf32, #tpu.memory_space<vmem>>, vector<1x8x128xf32>
    %97 = vector.shape_cast %96 : vector<1x8x128xf32> to vector<8x128xf32>
    %98 = vector.shape_cast %85 : vector<8x128xf32> to vector<1x8x128xf32>
    tpu.vector_store %arg7[%95, %c0_47, %c0_48], %98 {strides = array<i32>} : memref<8x8x128xf32, #tpu.memory_space<vmem>>, vector<1x8x128xf32>,
    %c2_i32 = arith.constant 2 : i32
    %c0_49 = arith.constant 0 : index
    %c0_50 = arith.constant 0 : index
    %99 = vector.load %arg9[%c0_49, %c0_50] : memref<8x128xbf16, #tpu.memory_space<vmem>>, vector<8x128xbf16>
    %c0_51 = arith.constant 0 : index
    %c0_52 = arith.constant 0 : index
    %100 = vector.load %arg10[%c0_51, %c0_52] : memref<8x128xf32, #tpu.memory_space<vmem>>, vector<8x128xf32>
    %101 = arith.index_cast %c2_i32 : i32 to index
    %c0_53 = arith.constant 0 : index
    %c0_54 = arith.constant 0 : index
    %102 = vector.load %arg8[%101, %c0_53, %c0_54] : memref<8x8x512xf32, #tpu.memory_space<vmem>>, vector<1x8x512xf32>
    %103 = vector.shape_cast %102 : vector<1x8x512xf32> to vector<8x512xf32>
    %cst_55 = arith.constant dense<0.000000e+00> : vector<8x512xf32>
    %104 = tpu.matmul %99, %12, %cst_55 {dimension_numbers = #tpu.dot_dimension_numbers<[1], [0], [0], [1], [0, 0, 1, 1], [], []>} : vector<8x128xbf16>, vector<128x512xbf16>, vector<8x512xf32> -> vector<8x512xf32>
    %105 = arith.addf %103, %104 : vector<8x512xf32>
    %106 = vector.extract_strided_slice %105 {offsets = [0, 0], sizes = [8, 128], strides = [1, 1]} : vector<8x512xf32> to vector<8x128xf32>
    %107 = arith.negf %106 : vector<8x128xf32>
    %108 = math.exp %107 : vector<8x128xf32>
    %cst_56 = arith.constant 1.000000e+00 : f32
    %109 = vector.broadcast %cst_56 : f32 to vector<8x128xf32>
    %110 = arith.addf %109, %108 : vector<8x128xf32>
    %111 = arith.divf %109, %110 : vector<8x128xf32>
    %112 = vector.extract_strided_slice %105 {offsets = [0, 128], sizes = [8, 128], strides = [1, 1]} : vector<8x512xf32> to vector<8x128xf32>
    %113 = arith.negf %112 : vector<8x128xf32>
    %114 = math.exp %113 : vector<8x128xf32>
    %cst_57 = arith.constant 1.000000e+00 : f32
    %115 = vector.broadcast %cst_57 : f32 to vector<8x128xf32>
    %116 = arith.addf %115, %114 : vector<8x128xf32>
    %117 = arith.divf %115, %116 : vector<8x128xf32>
    %118 = vector.extract_strided_slice %105 {offsets = [0, 256], sizes = [8, 128], strides = [1, 1]} : vector<8x512xf32> to vector<8x128xf32>
    %119 = math.tanh %118 : vector<8x128xf32>
    %120 = vector.extract_strided_slice %105 {offsets = [0, 384], sizes = [8, 128], strides = [1, 1]} : vector<8x512xf32> to vector<8x128xf32>
    %121 = arith.negf %120 : vector<8x128xf32>
    %122 = math.exp %121 : vector<8x128xf32>
    %cst_58 = arith.constant 1.000000e+00 : f32
    %123 = vector.broadcast %cst_58 : f32 to vector<8x128xf32>
    %124 = arith.addf %123, %122 : vector<8x128xf32>
    %125 = arith.divf %123, %124 : vector<8x128xf32>
    %126 = arith.mulf %117, %100 : vector<8x128xf32>
    %127 = arith.mulf %111, %119 : vector<8x128xf32>
    %128 = arith.addf %126, %127 : vector<8x128xf32>
    %129 = math.tanh %128 : vector<8x128xf32>
    %130 = arith.mulf %125, %129 : vector<8x128xf32>
    %131 = arith.truncf %130 : vector<8x128xf32> to vector<8x128xbf16>
    %c0_59 = arith.constant 0 : index
    %c0_60 = arith.constant 0 : index
    %132 = vector.load %arg9[%c0_59, %c0_60] : memref<8x128xbf16, #tpu.memory_space<vmem>>, vector<8x128xbf16>
    tpu.vector_store %arg9[%c0_59, %c0_60], %131 {strides = array<i32>} : memref<8x128xbf16, #tpu.memory_space<vmem>>, vector<8x128xbf16>,
    %c0_61 = arith.constant 0 : index
    %c0_62 = arith.constant 0 : index
    %133 = vector.load %arg10[%c0_61, %c0_62] : memref<8x128xf32, #tpu.memory_space<vmem>>, vector<8x128xf32>
    tpu.vector_store %arg10[%c0_61, %c0_62], %128 {strides = array<i32>} : memref<8x128xf32, #tpu.memory_space<vmem>>, vector<8x128xf32>,
    %134 = arith.index_cast %c2_i32 : i32 to index
    %c0_63 = arith.constant 0 : index
    %c0_64 = arith.constant 0 : index
    %135 = vector.load %arg6[%134, %c0_63, %c0_64] : memref<8x8x128xf32, #tpu.memory_space<vmem>>, vector<1x8x128xf32>
    %136 = vector.shape_cast %135 : vector<1x8x128xf32> to vector<8x128xf32>
    %137 = vector.shape_cast %130 : vector<8x128xf32> to vector<1x8x128xf32>
    tpu.vector_store %arg6[%134, %c0_63, %c0_64], %137 {strides = array<i32>} : memref<8x8x128xf32, #tpu.memory_space<vmem>>, vector<1x8x128xf32>,
    %138 = arith.index_cast %c2_i32 : i32 to index
    %c0_65 = arith.constant 0 : index
    %c0_66 = arith.constant 0 : index
    %139 = vector.load %arg7[%138, %c0_65, %c0_66] : memref<8x8x128xf32, #tpu.memory_space<vmem>>, vector<1x8x128xf32>
    %140 = vector.shape_cast %139 : vector<1x8x128xf32> to vector<8x128xf32>
    %141 = vector.shape_cast %128 : vector<8x128xf32> to vector<1x8x128xf32>
    tpu.vector_store %arg7[%138, %c0_65, %c0_66], %141 {strides = array<i32>} : memref<8x8x128xf32, #tpu.memory_space<vmem>>, vector<1x8x128xf32>,
    %c3_i32 = arith.constant 3 : i32
    %c0_67 = arith.constant 0 : index
    %c0_68 = arith.constant 0 : index
    %142 = vector.load %arg9[%c0_67, %c0_68] : memref<8x128xbf16, #tpu.memory_space<vmem>>, vector<8x128xbf16>
    %c0_69 = arith.constant 0 : index
    %c0_70 = arith.constant 0 : index
    %143 = vector.load %arg10[%c0_69, %c0_70] : memref<8x128xf32, #tpu.memory_space<vmem>>, vector<8x128xf32>
    %144 = arith.index_cast %c3_i32 : i32 to index
    %c0_71 = arith.constant 0 : index
    %c0_72 = arith.constant 0 : index
    %145 = vector.load %arg8[%144, %c0_71, %c0_72] : memref<8x8x512xf32, #tpu.memory_space<vmem>>, vector<1x8x512xf32>
    %146 = vector.shape_cast %145 : vector<1x8x512xf32> to vector<8x512xf32>
    %cst_73 = arith.constant dense<0.000000e+00> : vector<8x512xf32>
    %147 = tpu.matmul %142, %12, %cst_73 {dimension_numbers = #tpu.dot_dimension_numbers<[1], [0], [0], [1], [0, 0, 1, 1], [], []>} : vector<8x128xbf16>, vector<128x512xbf16>, vector<8x512xf32> -> vector<8x512xf32>
    %148 = arith.addf %146, %147 : vector<8x512xf32>
    %149 = vector.extract_strided_slice %148 {offsets = [0, 0], sizes = [8, 128], strides = [1, 1]} : vector<8x512xf32> to vector<8x128xf32>
    %150 = arith.negf %149 : vector<8x128xf32>
    %151 = math.exp %150 : vector<8x128xf32>
    %cst_74 = arith.constant 1.000000e+00 : f32
    %152 = vector.broadcast %cst_74 : f32 to vector<8x128xf32>
    %153 = arith.addf %152, %151 : vector<8x128xf32>
    %154 = arith.divf %152, %153 : vector<8x128xf32>
    %155 = vector.extract_strided_slice %148 {offsets = [0, 128], sizes = [8, 128], strides = [1, 1]} : vector<8x512xf32> to vector<8x128xf32>
    %156 = arith.negf %155 : vector<8x128xf32>
    %157 = math.exp %156 : vector<8x128xf32>
    %cst_75 = arith.constant 1.000000e+00 : f32
    %158 = vector.broadcast %cst_75 : f32 to vector<8x128xf32>
    %159 = arith.addf %158, %157 : vector<8x128xf32>
    %160 = arith.divf %158, %159 : vector<8x128xf32>
    %161 = vector.extract_strided_slice %148 {offsets = [0, 256], sizes = [8, 128], strides = [1, 1]} : vector<8x512xf32> to vector<8x128xf32>
    %162 = math.tanh %161 : vector<8x128xf32>
    %163 = vector.extract_strided_slice %148 {offsets = [0, 384], sizes = [8, 128], strides = [1, 1]} : vector<8x512xf32> to vector<8x128xf32>
    %164 = arith.negf %163 : vector<8x128xf32>
    %165 = math.exp %164 : vector<8x128xf32>
    %cst_76 = arith.constant 1.000000e+00 : f32
    %166 = vector.broadcast %cst_76 : f32 to vector<8x128xf32>
    %167 = arith.addf %166, %165 : vector<8x128xf32>
    %168 = arith.divf %166, %167 : vector<8x128xf32>
    %169 = arith.mulf %160, %143 : vector<8x128xf32>
    %170 = arith.mulf %154, %162 : vector<8x128xf32>
    %171 = arith.addf %169, %170 : vector<8x128xf32>
    %172 = math.tanh %171 : vector<8x128xf32>
    %173 = arith.mulf %168, %172 : vector<8x128xf32>
    %174 = arith.truncf %173 : vector<8x128xf32> to vector<8x128xbf16>
    %c0_77 = arith.constant 0 : index
    %c0_78 = arith.constant 0 : index
    %175 = vector.load %arg9[%c0_77, %c0_78] : memref<8x128xbf16, #tpu.memory_space<vmem>>, vector<8x128xbf16>
    tpu.vector_store %arg9[%c0_77, %c0_78], %174 {strides = array<i32>} : memref<8x128xbf16, #tpu.memory_space<vmem>>, vector<8x128xbf16>,
    %c0_79 = arith.constant 0 : index
    %c0_80 = arith.constant 0 : index
    %176 = vector.load %arg10[%c0_79, %c0_80] : memref<8x128xf32, #tpu.memory_space<vmem>>, vector<8x128xf32>
    tpu.vector_store %arg10[%c0_79, %c0_80], %171 {strides = array<i32>} : memref<8x128xf32, #tpu.memory_space<vmem>>, vector<8x128xf32>,
    %177 = arith.index_cast %c3_i32 : i32 to index
    %c0_81 = arith.constant 0 : index
    %c0_82 = arith.constant 0 : index
    %178 = vector.load %arg6[%177, %c0_81, %c0_82] : memref<8x8x128xf32, #tpu.memory_space<vmem>>, vector<1x8x128xf32>
    %179 = vector.shape_cast %178 : vector<1x8x128xf32> to vector<8x128xf32>
    %180 = vector.shape_cast %173 : vector<8x128xf32> to vector<1x8x128xf32>
    tpu.vector_store %arg6[%177, %c0_81, %c0_82], %180 {strides = array<i32>} : memref<8x8x128xf32, #tpu.memory_space<vmem>>, vector<1x8x128xf32>,
    %181 = arith.index_cast %c3_i32 : i32 to index
    %c0_83 = arith.constant 0 : index
    %c0_84 = arith.constant 0 : index
    %182 = vector.load %arg7[%181, %c0_83, %c0_84] : memref<8x8x128xf32, #tpu.memory_space<vmem>>, vector<1x8x128xf32>
    %183 = vector.shape_cast %182 : vector<1x8x128xf32> to vector<8x128xf32>
    %184 = vector.shape_cast %171 : vector<8x128xf32> to vector<1x8x128xf32>
    tpu.vector_store %arg7[%181, %c0_83, %c0_84], %184 {strides = array<i32>} : memref<8x8x128xf32, #tpu.memory_space<vmem>>, vector<1x8x128xf32>,
    %c4_i32 = arith.constant 4 : i32
    %c0_85 = arith.constant 0 : index
    %c0_86 = arith.constant 0 : index
    %185 = vector.load %arg9[%c0_85, %c0_86] : memref<8x128xbf16, #tpu.memory_space<vmem>>, vector<8x128xbf16>
    %c0_87 = arith.constant 0 : index
    %c0_88 = arith.constant 0 : index
    %186 = vector.load %arg10[%c0_87, %c0_88] : memref<8x128xf32, #tpu.memory_space<vmem>>, vector<8x128xf32>
    %187 = arith.index_cast %c4_i32 : i32 to index
    %c0_89 = arith.constant 0 : index
    %c0_90 = arith.constant 0 : index
    %188 = vector.load %arg8[%187, %c0_89, %c0_90] : memref<8x8x512xf32, #tpu.memory_space<vmem>>, vector<1x8x512xf32>
    %189 = vector.shape_cast %188 : vector<1x8x512xf32> to vector<8x512xf32>
    %cst_91 = arith.constant dense<0.000000e+00> : vector<8x512xf32>
    %190 = tpu.matmul %185, %12, %cst_91 {dimension_numbers = #tpu.dot_dimension_numbers<[1], [0], [0], [1], [0, 0, 1, 1], [], []>} : vector<8x128xbf16>, vector<128x512xbf16>, vector<8x512xf32> -> vector<8x512xf32>
    %191 = arith.addf %189, %190 : vector<8x512xf32>
    %192 = vector.extract_strided_slice %191 {offsets = [0, 0], sizes = [8, 128], strides = [1, 1]} : vector<8x512xf32> to vector<8x128xf32>
    %193 = arith.negf %192 : vector<8x128xf32>
    %194 = math.exp %193 : vector<8x128xf32>
    %cst_92 = arith.constant 1.000000e+00 : f32
    %195 = vector.broadcast %cst_92 : f32 to vector<8x128xf32>
    %196 = arith.addf %195, %194 : vector<8x128xf32>
    %197 = arith.divf %195, %196 : vector<8x128xf32>
    %198 = vector.extract_strided_slice %191 {offsets = [0, 128], sizes = [8, 128], strides = [1, 1]} : vector<8x512xf32> to vector<8x128xf32>
    %199 = arith.negf %198 : vector<8x128xf32>
    %200 = math.exp %199 : vector<8x128xf32>
    %cst_93 = arith.constant 1.000000e+00 : f32
    %201 = vector.broadcast %cst_93 : f32 to vector<8x128xf32>
    %202 = arith.addf %201, %200 : vector<8x128xf32>
    %203 = arith.divf %201, %202 : vector<8x128xf32>
    %204 = vector.extract_strided_slice %191 {offsets = [0, 256], sizes = [8, 128], strides = [1, 1]} : vector<8x512xf32> to vector<8x128xf32>
    %205 = math.tanh %204 : vector<8x128xf32>
    %206 = vector.extract_strided_slice %191 {offsets = [0, 384], sizes = [8, 128], strides = [1, 1]} : vector<8x512xf32> to vector<8x128xf32>
    %207 = arith.negf %206 : vector<8x128xf32>
    %208 = math.exp %207 : vector<8x128xf32>
    %cst_94 = arith.constant 1.000000e+00 : f32
    %209 = vector.broadcast %cst_94 : f32 to vector<8x128xf32>
    %210 = arith.addf %209, %208 : vector<8x128xf32>
    %211 = arith.divf %209, %210 : vector<8x128xf32>
    %212 = arith.mulf %203, %186 : vector<8x128xf32>
    %213 = arith.mulf %197, %205 : vector<8x128xf32>
    %214 = arith.addf %212, %213 : vector<8x128xf32>
    %215 = math.tanh %214 : vector<8x128xf32>
    %216 = arith.mulf %211, %215 : vector<8x128xf32>
    %217 = arith.truncf %216 : vector<8x128xf32> to vector<8x128xbf16>
    %c0_95 = arith.constant 0 : index
    %c0_96 = arith.constant 0 : index
    %218 = vector.load %arg9[%c0_95, %c0_96] : memref<8x128xbf16, #tpu.memory_space<vmem>>, vector<8x128xbf16>
    tpu.vector_store %arg9[%c0_95, %c0_96], %217 {strides = array<i32>} : memref<8x128xbf16, #tpu.memory_space<vmem>>, vector<8x128xbf16>,
    %c0_97 = arith.constant 0 : index
    %c0_98 = arith.constant 0 : index
    %219 = vector.load %arg10[%c0_97, %c0_98] : memref<8x128xf32, #tpu.memory_space<vmem>>, vector<8x128xf32>
    tpu.vector_store %arg10[%c0_97, %c0_98], %214 {strides = array<i32>} : memref<8x128xf32, #tpu.memory_space<vmem>>, vector<8x128xf32>,
    %220 = arith.index_cast %c4_i32 : i32 to index
    %c0_99 = arith.constant 0 : index
    %c0_100 = arith.constant 0 : index
    %221 = vector.load %arg6[%220, %c0_99, %c0_100] : memref<8x8x128xf32, #tpu.memory_space<vmem>>, vector<1x8x128xf32>
    %222 = vector.shape_cast %221 : vector<1x8x128xf32> to vector<8x128xf32>
    %223 = vector.shape_cast %216 : vector<8x128xf32> to vector<1x8x128xf32>
    tpu.vector_store %arg6[%220, %c0_99, %c0_100], %223 {strides = array<i32>} : memref<8x8x128xf32, #tpu.memory_space<vmem>>, vector<1x8x128xf32>,
    %224 = arith.index_cast %c4_i32 : i32 to index
    %c0_101 = arith.constant 0 : index
    %c0_102 = arith.constant 0 : index
    %225 = vector.load %arg7[%224, %c0_101, %c0_102] : memref<8x8x128xf32, #tpu.memory_space<vmem>>, vector<1x8x128xf32>
    %226 = vector.shape_cast %225 : vector<1x8x128xf32> to vector<8x128xf32>
    %227 = vector.shape_cast %214 : vector<8x128xf32> to vector<1x8x128xf32>
    tpu.vector_store %arg7[%224, %c0_101, %c0_102], %227 {strides = array<i32>} : memref<8x8x128xf32, #tpu.memory_space<vmem>>, vector<1x8x128xf32>,
    %c5_i32 = arith.constant 5 : i32
    %c0_103 = arith.constant 0 : index
    %c0_104 = arith.constant 0 : index
    %228 = vector.load %arg9[%c0_103, %c0_104] : memref<8x128xbf16, #tpu.memory_space<vmem>>, vector<8x128xbf16>
    %c0_105 = arith.constant 0 : index
    %c0_106 = arith.constant 0 : index
    %229 = vector.load %arg10[%c0_105, %c0_106] : memref<8x128xf32, #tpu.memory_space<vmem>>, vector<8x128xf32>
    %230 = arith.index_cast %c5_i32 : i32 to index
    %c0_107 = arith.constant 0 : index
    %c0_108 = arith.constant 0 : index
    %231 = vector.load %arg8[%230, %c0_107, %c0_108] : memref<8x8x512xf32, #tpu.memory_space<vmem>>, vector<1x8x512xf32>
    %232 = vector.shape_cast %231 : vector<1x8x512xf32> to vector<8x512xf32>
    %cst_109 = arith.constant dense<0.000000e+00> : vector<8x512xf32>
    %233 = tpu.matmul %228, %12, %cst_109 {dimension_numbers = #tpu.dot_dimension_numbers<[1], [0], [0], [1], [0, 0, 1, 1], [], []>} : vector<8x128xbf16>, vector<128x512xbf16>, vector<8x512xf32> -> vector<8x512xf32>
    %234 = arith.addf %232, %233 : vector<8x512xf32>
    %235 = vector.extract_strided_slice %234 {offsets = [0, 0], sizes = [8, 128], strides = [1, 1]} : vector<8x512xf32> to vector<8x128xf32>
    %236 = arith.negf %235 : vector<8x128xf32>
    %237 = math.exp %236 : vector<8x128xf32>
    %cst_110 = arith.constant 1.000000e+00 : f32
    %238 = vector.broadcast %cst_110 : f32 to vector<8x128xf32>
    %239 = arith.addf %238, %237 : vector<8x128xf32>
    %240 = arith.divf %238, %239 : vector<8x128xf32>
    %241 = vector.extract_strided_slice %234 {offsets = [0, 128], sizes = [8, 128], strides = [1, 1]} : vector<8x512xf32> to vector<8x128xf32>
    %242 = arith.negf %241 : vector<8x128xf32>
    %243 = math.exp %242 : vector<8x128xf32>
    %cst_111 = arith.constant 1.000000e+00 : f32
    %244 = vector.broadcast %cst_111 : f32 to vector<8x128xf32>
    %245 = arith.addf %244, %243 : vector<8x128xf32>
    %246 = arith.divf %244, %245 : vector<8x128xf32>
    %247 = vector.extract_strided_slice %234 {offsets = [0, 256], sizes = [8, 128], strides = [1, 1]} : vector<8x512xf32> to vector<8x128xf32>
    %248 = math.tanh %247 : vector<8x128xf32>
    %249 = vector.extract_strided_slice %234 {offsets = [0, 384], sizes = [8, 128], strides = [1, 1]} : vector<8x512xf32> to vector<8x128xf32>
    %250 = arith.negf %249 : vector<8x128xf32>
    %251 = math.exp %250 : vector<8x128xf32>
    %cst_112 = arith.constant 1.000000e+00 : f32
    %252 = vector.broadcast %cst_112 : f32 to vector<8x128xf32>
    %253 = arith.addf %252, %251 : vector<8x128xf32>
    %254 = arith.divf %252, %253 : vector<8x128xf32>
    %255 = arith.mulf %246, %229 : vector<8x128xf32>
    %256 = arith.mulf %240, %248 : vector<8x128xf32>
    %257 = arith.addf %255, %256 : vector<8x128xf32>
    %258 = math.tanh %257 : vector<8x128xf32>
    %259 = arith.mulf %254, %258 : vector<8x128xf32>
    %260 = arith.truncf %259 : vector<8x128xf32> to vector<8x128xbf16>
    %c0_113 = arith.constant 0 : index
    %c0_114 = arith.constant 0 : index
    %261 = vector.load %arg9[%c0_113, %c0_114] : memref<8x128xbf16, #tpu.memory_space<vmem>>, vector<8x128xbf16>
    tpu.vector_store %arg9[%c0_113, %c0_114], %260 {strides = array<i32>} : memref<8x128xbf16, #tpu.memory_space<vmem>>, vector<8x128xbf16>,
    %c0_115 = arith.constant 0 : index
    %c0_116 = arith.constant 0 : index
    %262 = vector.load %arg10[%c0_115, %c0_116] : memref<8x128xf32, #tpu.memory_space<vmem>>, vector<8x128xf32>
    tpu.vector_store %arg10[%c0_115, %c0_116], %257 {strides = array<i32>} : memref<8x128xf32, #tpu.memory_space<vmem>>, vector<8x128xf32>,
    %263 = arith.index_cast %c5_i32 : i32 to index
    %c0_117 = arith.constant 0 : index
    %c0_118 = arith.constant 0 : index
    %264 = vector.load %arg6[%263, %c0_117, %c0_118] : memref<8x8x128xf32, #tpu.memory_space<vmem>>, vector<1x8x128xf32>
    %265 = vector.shape_cast %264 : vector<1x8x128xf32> to vector<8x128xf32>
    %266 = vector.shape_cast %259 : vector<8x128xf32> to vector<1x8x128xf32>
    tpu.vector_store %arg6[%263, %c0_117, %c0_118], %266 {strides = array<i32>} : memref<8x8x128xf32, #tpu.memory_space<vmem>>, vector<1x8x128xf32>,
    %267 = arith.index_cast %c5_i32 : i32 to index
    %c0_119 = arith.constant 0 : index
    %c0_120 = arith.constant 0 : index
    %268 = vector.load %arg7[%267, %c0_119, %c0_120] : memref<8x8x128xf32, #tpu.memory_space<vmem>>, vector<1x8x128xf32>
    %269 = vector.shape_cast %268 : vector<1x8x128xf32> to vector<8x128xf32>
    %270 = vector.shape_cast %257 : vector<8x128xf32> to vector<1x8x128xf32>
    tpu.vector_store %arg7[%267, %c0_119, %c0_120], %270 {strides = array<i32>} : memref<8x8x128xf32, #tpu.memory_space<vmem>>, vector<1x8x128xf32>,
    %c6_i32 = arith.constant 6 : i32
    %c0_121 = arith.constant 0 : index
    %c0_122 = arith.constant 0 : index
    %271 = vector.load %arg9[%c0_121, %c0_122] : memref<8x128xbf16, #tpu.memory_space<vmem>>, vector<8x128xbf16>
    %c0_123 = arith.constant 0 : index
    %c0_124 = arith.constant 0 : index
    %272 = vector.load %arg10[%c0_123, %c0_124] : memref<8x128xf32, #tpu.memory_space<vmem>>, vector<8x128xf32>
    %273 = arith.index_cast %c6_i32 : i32 to index
    %c0_125 = arith.constant 0 : index
    %c0_126 = arith.constant 0 : index
    %274 = vector.load %arg8[%273, %c0_125, %c0_126] : memref<8x8x512xf32, #tpu.memory_space<vmem>>, vector<1x8x512xf32>
    %275 = vector.shape_cast %274 : vector<1x8x512xf32> to vector<8x512xf32>
    %cst_127 = arith.constant dense<0.000000e+00> : vector<8x512xf32>
    %276 = tpu.matmul %271, %12, %cst_127 {dimension_numbers = #tpu.dot_dimension_numbers<[1], [0], [0], [1], [0, 0, 1, 1], [], []>} : vector<8x128xbf16>, vector<128x512xbf16>, vector<8x512xf32> -> vector<8x512xf32>
    %277 = arith.addf %275, %276 : vector<8x512xf32>
    %278 = vector.extract_strided_slice %277 {offsets = [0, 0], sizes = [8, 128], strides = [1, 1]} : vector<8x512xf32> to vector<8x128xf32>
    %279 = arith.negf %278 : vector<8x128xf32>
    %280 = math.exp %279 : vector<8x128xf32>
    %cst_128 = arith.constant 1.000000e+00 : f32
    %281 = vector.broadcast %cst_128 : f32 to vector<8x128xf32>
    %282 = arith.addf %281, %280 : vector<8x128xf32>
    %283 = arith.divf %281, %282 : vector<8x128xf32>
    %284 = vector.extract_strided_slice %277 {offsets = [0, 128], sizes = [8, 128], strides = [1, 1]} : vector<8x512xf32> to vector<8x128xf32>
    %285 = arith.negf %284 : vector<8x128xf32>
    %286 = math.exp %285 : vector<8x128xf32>
    %cst_129 = arith.constant 1.000000e+00 : f32
    %287 = vector.broadcast %cst_129 : f32 to vector<8x128xf32>
    %288 = arith.addf %287, %286 : vector<8x128xf32>
    %289 = arith.divf %287, %288 : vector<8x128xf32>
    %290 = vector.extract_strided_slice %277 {offsets = [0, 256], sizes = [8, 128], strides = [1, 1]} : vector<8x512xf32> to vector<8x128xf32>
    %291 = math.tanh %290 : vector<8x128xf32>
    %292 = vector.extract_strided_slice %277 {offsets = [0, 384], sizes = [8, 128], strides = [1, 1]} : vector<8x512xf32> to vector<8x128xf32>
    %293 = arith.negf %292 : vector<8x128xf32>
    %294 = math.exp %293 : vector<8x128xf32>
    %cst_130 = arith.constant 1.000000e+00 : f32
    %295 = vector.broadcast %cst_130 : f32 to vector<8x128xf32>
    %296 = arith.addf %295, %294 : vector<8x128xf32>
    %297 = arith.divf %295, %296 : vector<8x128xf32>
    %298 = arith.mulf %289, %272 : vector<8x128xf32>
    %299 = arith.mulf %283, %291 : vector<8x128xf32>
    %300 = arith.addf %298, %299 : vector<8x128xf32>
    %301 = math.tanh %300 : vector<8x128xf32>
    %302 = arith.mulf %297, %301 : vector<8x128xf32>
    %303 = arith.truncf %302 : vector<8x128xf32> to vector<8x128xbf16>
    %c0_131 = arith.constant 0 : index
    %c0_132 = arith.constant 0 : index
    %304 = vector.load %arg9[%c0_131, %c0_132] : memref<8x128xbf16, #tpu.memory_space<vmem>>, vector<8x128xbf16>
    tpu.vector_store %arg9[%c0_131, %c0_132], %303 {strides = array<i32>} : memref<8x128xbf16, #tpu.memory_space<vmem>>, vector<8x128xbf16>,
    %c0_133 = arith.constant 0 : index
    %c0_134 = arith.constant 0 : index
    %305 = vector.load %arg10[%c0_133, %c0_134] : memref<8x128xf32, #tpu.memory_space<vmem>>, vector<8x128xf32>
    tpu.vector_store %arg10[%c0_133, %c0_134], %300 {strides = array<i32>} : memref<8x128xf32, #tpu.memory_space<vmem>>, vector<8x128xf32>,
    %306 = arith.index_cast %c6_i32 : i32 to index
    %c0_135 = arith.constant 0 : index
    %c0_136 = arith.constant 0 : index
    %307 = vector.load %arg6[%306, %c0_135, %c0_136] : memref<8x8x128xf32, #tpu.memory_space<vmem>>, vector<1x8x128xf32>
    %308 = vector.shape_cast %307 : vector<1x8x128xf32> to vector<8x128xf32>
    %309 = vector.shape_cast %302 : vector<8x128xf32> to vector<1x8x128xf32>
    tpu.vector_store %arg6[%306, %c0_135, %c0_136], %309 {strides = array<i32>} : memref<8x8x128xf32, #tpu.memory_space<vmem>>, vector<1x8x128xf32>,
    %310 = arith.index_cast %c6_i32 : i32 to index
    %c0_137 = arith.constant 0 : index
    %c0_138 = arith.constant 0 : index
    %311 = vector.load %arg7[%310, %c0_137, %c0_138] : memref<8x8x128xf32, #tpu.memory_space<vmem>>, vector<1x8x128xf32>
    %312 = vector.shape_cast %311 : vector<1x8x128xf32> to vector<8x128xf32>
    %313 = vector.shape_cast %300 : vector<8x128xf32> to vector<1x8x128xf32>
    tpu.vector_store %arg7[%310, %c0_137, %c0_138], %313 {strides = array<i32>} : memref<8x8x128xf32, #tpu.memory_space<vmem>>, vector<1x8x128xf32>,
    %c7_i32 = arith.constant 7 : i32
    %c0_139 = arith.constant 0 : index
    %c0_140 = arith.constant 0 : index
    %314 = vector.load %arg9[%c0_139, %c0_140] : memref<8x128xbf16, #tpu.memory_space<vmem>>, vector<8x128xbf16>
    %c0_141 = arith.constant 0 : index
    %c0_142 = arith.constant 0 : index
    %315 = vector.load %arg10[%c0_141, %c0_142] : memref<8x128xf32, #tpu.memory_space<vmem>>, vector<8x128xf32>
    %316 = arith.index_cast %c7_i32 : i32 to index
    %c0_143 = arith.constant 0 : index
    %c0_144 = arith.constant 0 : index
    %317 = vector.load %arg8[%316, %c0_143, %c0_144] : memref<8x8x512xf32, #tpu.memory_space<vmem>>, vector<1x8x512xf32>
    %318 = vector.shape_cast %317 : vector<1x8x512xf32> to vector<8x512xf32>
    %cst_145 = arith.constant dense<0.000000e+00> : vector<8x512xf32>
    %319 = tpu.matmul %314, %12, %cst_145 {dimension_numbers = #tpu.dot_dimension_numbers<[1], [0], [0], [1], [0, 0, 1, 1], [], []>} : vector<8x128xbf16>, vector<128x512xbf16>, vector<8x512xf32> -> vector<8x512xf32>
    %320 = arith.addf %318, %319 : vector<8x512xf32>
    %321 = vector.extract_strided_slice %320 {offsets = [0, 0], sizes = [8, 128], strides = [1, 1]} : vector<8x512xf32> to vector<8x128xf32>
    %322 = arith.negf %321 : vector<8x128xf32>
    %323 = math.exp %322 : vector<8x128xf32>
    %cst_146 = arith.constant 1.000000e+00 : f32
    %324 = vector.broadcast %cst_146 : f32 to vector<8x128xf32>
    %325 = arith.addf %324, %323 : vector<8x128xf32>
    %326 = arith.divf %324, %325 : vector<8x128xf32>
    %327 = vector.extract_strided_slice %320 {offsets = [0, 128], sizes = [8, 128], strides = [1, 1]} : vector<8x512xf32> to vector<8x128xf32>
    %328 = arith.negf %327 : vector<8x128xf32>
    %329 = math.exp %328 : vector<8x128xf32>
    %cst_147 = arith.constant 1.000000e+00 : f32
    %330 = vector.broadcast %cst_147 : f32 to vector<8x128xf32>
    %331 = arith.addf %330, %329 : vector<8x128xf32>
    %332 = arith.divf %330, %331 : vector<8x128xf32>
    %333 = vector.extract_strided_slice %320 {offsets = [0, 256], sizes = [8, 128], strides = [1, 1]} : vector<8x512xf32> to vector<8x128xf32>
    %334 = math.tanh %333 : vector<8x128xf32>
    %335 = vector.extract_strided_slice %320 {offsets = [0, 384], sizes = [8, 128], strides = [1, 1]} : vector<8x512xf32> to vector<8x128xf32>
    %336 = arith.negf %335 : vector<8x128xf32>
    %337 = math.exp %336 : vector<8x128xf32>
    %cst_148 = arith.constant 1.000000e+00 : f32
    %338 = vector.broadcast %cst_148 : f32 to vector<8x128xf32>
    %339 = arith.addf %338, %337 : vector<8x128xf32>
    %340 = arith.divf %338, %339 : vector<8x128xf32>
    %341 = arith.mulf %332, %315 : vector<8x128xf32>
    %342 = arith.mulf %326, %334 : vector<8x128xf32>
    %343 = arith.addf %341, %342 : vector<8x128xf32>
    %344 = math.tanh %343 : vector<8x128xf32>
    %345 = arith.mulf %340, %344 : vector<8x128xf32>
    %346 = arith.truncf %345 : vector<8x128xf32> to vector<8x128xbf16>
    %c0_149 = arith.constant 0 : index
    %c0_150 = arith.constant 0 : index
    %347 = vector.load %arg9[%c0_149, %c0_150] : memref<8x128xbf16, #tpu.memory_space<vmem>>, vector<8x128xbf16>
    tpu.vector_store %arg9[%c0_149, %c0_150], %346 {strides = array<i32>} : memref<8x128xbf16, #tpu.memory_space<vmem>>, vector<8x128xbf16>,
    %c0_151 = arith.constant 0 : index
    %c0_152 = arith.constant 0 : index
    %348 = vector.load %arg10[%c0_151, %c0_152] : memref<8x128xf32, #tpu.memory_space<vmem>>, vector<8x128xf32>
    tpu.vector_store %arg10[%c0_151, %c0_152], %343 {strides = array<i32>} : memref<8x128xf32, #tpu.memory_space<vmem>>, vector<8x128xf32>,
    %349 = arith.index_cast %c7_i32 : i32 to index
    %c0_153 = arith.constant 0 : index
    %c0_154 = arith.constant 0 : index
    %350 = vector.load %arg6[%349, %c0_153, %c0_154] : memref<8x8x128xf32, #tpu.memory_space<vmem>>, vector<1x8x128xf32>
    %351 = vector.shape_cast %350 : vector<1x8x128xf32> to vector<8x128xf32>
    %352 = vector.shape_cast %345 : vector<8x128xf32> to vector<1x8x128xf32>
    tpu.vector_store %arg6[%349, %c0_153, %c0_154], %352 {strides = array<i32>} : memref<8x8x128xf32, #tpu.memory_space<vmem>>, vector<1x8x128xf32>,
    %353 = arith.index_cast %c7_i32 : i32 to index
    %c0_155 = arith.constant 0 : index
    %c0_156 = arith.constant 0 : index
    %354 = vector.load %arg7[%353, %c0_155, %c0_156] : memref<8x8x128xf32, #tpu.memory_space<vmem>>, vector<1x8x128xf32>
    %355 = vector.shape_cast %354 : vector<1x8x128xf32> to vector<8x128xf32>
    %356 = vector.shape_cast %343 : vector<8x128xf32> to vector<1x8x128xf32>
    tpu.vector_store %arg7[%353, %c0_155, %c0_156], %356 {strides = array<i32>} : memref<8x8x128xf32, #tpu.memory_space<vmem>>, vector<1x8x128xf32>,
    %c8_i32 = arith.constant 8 : i32
    return
  }
  func.func @transform_0(%arg0: i32, %arg1: i32) -> (i32, i32, i32) {
    %c0_i32 = arith.constant 0 : i32
    %c0_i32_0 = arith.constant 0 : i32
    return %arg1, %arg0, %c0_i32 : i32, i32, i32
  }
  func.func @transform_1(%arg0: i32, %arg1: i32) -> (i32, i32) {
    %c0_i32 = arith.constant 0 : i32
    %c0_i32_0 = arith.constant 0 : i32
    %c0_i32_1 = arith.constant 0 : i32
    return %c0_i32, %c0_i32_0 : i32, i32
  }
  func.func @transform_2(%arg0: i32, %arg1: i32) -> (i32, i32) {
    %c0_i32 = arith.constant 0 : i32
    %c0_i32_0 = arith.constant 0 : i32
    %c0_i32_1 = arith.constant 0 : i32
    return %c0_i32, %c0_i32_0 : i32, i32
  }
  func.func @transform_3(%arg0: i32, %arg1: i32) -> (i32, i32) {
    %c0_i32 = arith.constant 0 : i32
    %c0_i32_0 = arith.constant 0 : i32
    %c0_i32_1 = arith.constant 0 : i32
    return %c0_i32, %c0_i32_0 : i32, i32
  }
  func.func @transform_4(%arg0: i32, %arg1: i32) -> (i32, i32, i32) {
    %c0_i32 = arith.constant 0 : i32
    %c0_i32_0 = arith.constant 0 : i32
    return %arg1, %arg0, %c0_i32 : i32, i32, i32
  }
  func.func @transform_5(%arg0: i32, %arg1: i32) -> (i32, i32, i32) {
    %c0_i32 = arith.constant 0 : i32
    %c0_i32_0 = arith.constant 0 : i32
    return %arg1, %arg0, %c0_i32 : i32, i32, i32
  }
}

</mosaic_0001>

<bundles_post_ra>
// kernel: tpu_custom_call.1
= control target key start
LH: loop header
LB: loop body
LE: loop exit
PB: predicated region body
PF: predicated region fallthrough
CT: control target
= control target key end

     0   :  { %s3635_s0 = inlined_call_operand.hbm [shape: bf16[16,8,128], index: 0, kind: input, shape index: {}]   ;;  %s3636_s1 = inlined_call_operand.hbm [shape: bf16[128,512], index: 1, kind: input, shape index: {}]   ;;  %s3637_s2 = inlined_call_operand.hbm [shape: bf16[128,512], index: 2, kind: input, shape index: {}]   ;;  %s3638_s3 = inlined_call_operand.vmem [shape: f32[1,512], index: 3, kind: input, shape index: {}]   ;;  %s3639_s4 = inlined_call_operand.hbm [shape: f32[16,8,128], index: 4, kind: output, shape index: {0}]   ;;  %s3640_s5 = inlined_call_operand.hbm [shape: f32[16,8,128], index: 5, kind: output, shape index: {1}]  }
   0x1   :  { %3646 = sst [smem:[#allocation37_spill]] %s3636_s1 }
   0x2   :  { %11 = vsyncpa [#allocation6], 0 }
   0x3   :  { %13 = vsyncpa [#allocation6 + $0x1], 0 }
   0x4   :  { %14 = vsyncpa [#allocation9], 0 }
   0x5   :  { %15 = vsyncpa [#allocation7], 0 }
   0x6   :  { %17 = vsyncpa [#allocation7 + $0x1], 0 }
   0x7   :  { %18 = vsyncpa [#allocation13], 0 }
   0x8   :  { %20 = vsyncpa [#allocation13 + $0x1], 0  ;;  %s2822_s18 = smov 0   ;;  %s2824_s19 = smov 0  }
   0x9   :  { %s2826_s20 = smov 0   ;;  %s2828_s21 = smov 0  }
   0xa   :  { %s2830_s22 = smov 0   ;;  %s2832_s23 = smov 0  }
   0xb LB: > { %s2092_s24 = sadd.s32 4294967295, %s2776_s23   ;;  %s2093_s25 = sadd.s32 4294967294, %s2776_s23   ;;  %s2776_s23 = sphi %s2832_s23, %s26_s23   ;;  %s2772_s22 = sphi %s2830_s22, %s3703_s22   ;;  %s2768_s21 = sphi %s2828_s21, %s3702_s21   ;;  %s2764_s20 = sphi %s2826_s20, %s3701_s20   ;;  %s2760_s19 = sphi %s2824_s19, %s3700_s19   ;;  %s2756_s18 = sphi %s2822_s18, %s3699_s18  }
   0xc   : > { %p60_p0 = scmp.ne.s32.totalorder %s2760_s19, %s2756_s18  ;;  %p2856_p1 = scmp.eq.s32.totalorder %s2092_s24, 0 }
   0xd   : > { %p2860_p2 = scmp.eq.s32.totalorder %s2092_s24, 1  ;;  %p155_p3 = scmp.eq.s32.totalorder %s2093_s25, 1 }
   0xe   : > { %s3647_s26 = scalar_select %p2856_p1, 1, 0 }
   0xf   : > { %p2866_p4 = por %p2856_p1, %p60_p0  ;;  %p2094_p5 = scmp.ge.s32.totalorder %s2776_s23, 1 }
  0x10   : > { %p2871_p6 = por %p155_p3, %p60_p0  ;;  %p190_p7 = scmp.lt.s32.totalorder %s2776_s23, 3 }
  0x11   : > { %s3649_s28 = scalar_select %p2866_p4, 1, 0 }
  0x12   : > { %s3650_s29 = scalar_select %p2871_p6, 1, 0 }
  0x13   : > { %p2876_p8 = pnand %p2094_p5, %p190_p7  ;;  %s2778_s6 = smov [#allocation8]  }
  0x14   : > { %s202_s7 = sshll.u32 %s2778_s6, 4  ;;  %s2779_s9 = smov [#allocation10]   ;;  %s203_s7 = int_to_ptr.vmem [resolvable:$true] %s202_s7 }
  0x15   : > { %p2239_p9 = pneg %p2876_p8  ;;  %s215_s10 = sshll.u32 %s2779_s9, 4  ;;  %s216_s10 = int_to_ptr.vmem [resolvable:$true] %s215_s10 }
  0x16   : > { %s2593_s11 = scalar_lea.vmem %s203_s7, 4096  ;;  %p2601_p5 = scmp.lt.s32.totalorder %s203_s7, %s203_s7 }
  0x17   : > { %p2885_p11 = pnand %p2239_p9, %p2856_p1  ;;  %p2594_p13 = scmp.ne.s32.totalorder %s203_s7, %s2593_s11 }
  0x18   : > { %p2602_p7 = scmp.lt.s32.totalorder %s2593_s11, %s2593_s11 }
  0x19   : > { %p2584_p12 = pneg %p2885_p11 }
  0x1a   : > { %p2603_p10 = por %p2602_p7, %p2601_p5 }
  0x1b   : > { %p2596_p0 = pnand %p2594_p13, %p2584_p12 }
  0x1d   : > { %p2597_p3 = pneg %p2596_p0 }
  0x1f   : > { %p2604_p9 = pnand %p2603_p10, %p2597_p3 }
  0x21   : > { %2607 = shalt.err (!%p2604_p9)
}
  0x22   : > { %s2780_s12 = smov 256   ;;  %s2781_s13 = smov 16  }
  0x23   : > { %s3653_s1 = sld [smem:[#allocation37_spill]]  ;;  %s2619_s16 = scalar_lea.vmem %s216_s10, 4096 }
  0x24   : > { %p2620_p6 = scmp.ne.s32.totalorder %s216_s10, %s2619_s16  ;;  %p2627_p1 = scmp.lt.s32.totalorder %s216_s10, %s216_s10 }
  0x25   : > { %p2628_p4 = scmp.lt.s32.totalorder %s2619_s16, %s2619_s16 }
  0x26   : > { %p2622_p13 = pnand %p2620_p6, %p2584_p12 }
  0x27   : > { %p2629_p5 = por %p2628_p4, %p2627_p1 }
  0x28   : > { %p2623_p0 = pneg %p2622_p13 }
  0x29   : > { %2242 = dma.hbm_to_vmem [thread:$0]  (!%p2885_p11), %s3653_s1, 4096, %s203_s7, [#allocation9], %s2780_s12, %s2780_s12, %s2781_s13  }
  0x2a   : > { %p2630_p10 = pnand %p2629_p5, %p2623_p0 }
  0x2c   : > { %2633 = shalt.err (!%p2630_p10)
}
  0x2d   : > { %2245 = dma.hbm_to_vmem [thread:$0]  (!%p2885_p11), %s3637_s2, 4096, %s216_s10, [#allocation9], %s2780_s12, %s2780_s12, %s2781_s13  }
  0x2e   : > { %s35_s25 = sadd.s32 1, %s2772_s22  ;;  %s47_s6 = sadd.s32 1, %s2764_s20 }
  0x2f   : > { %p36_p1 = scmp.ge.s32.totalorder %s35_s25, 2  ;;  %p54_p4 = scmp.ne.s32.totalorder %s2764_s20, %s2760_s19 }
  0x30   : > { %p55_p6 = scmp.eq.s32.totalorder %s2776_s23, 0  ;;  %p2259_p12 = scmp.lt.s32.totalorder %s2776_s23, 2 }
  0x31   : > { %s3705_s25 = smov (%p36_p1, %s35_s25), 0  ;;  %p2917_p7 = por %p2860_p2, %p54_p4 }
  0x32   : > { %p56_p3 = por %p55_p6, %p54_p4  ;;  %s42_s8 = ssub.s32 %s2772_s22, %s3705_s25 }
  0x33   : > { %s232_s9 = sand.u32 1, %s2764_s20   ;;  %p45_p9 = scmp.eq.s32.totalorder %s42_s8, 0 }
  0x34   : > { %s2098_s10 = sshll.u32 %s232_s9, 5  ;;  %s2222_s11 = sshll.u32 %s2772_s22, 9 }
  0x35   : > { %s2926_s12 = scalar_select %p45_p9, %s2764_s20, %s47_s6  }
  0x36   : > { %s243_s15 = scalar_lea.hbm %s3635_s0, %s2222_s11  ;;  %s236_s16 = scalar_lea.vmem [#allocation5], %s2098_s10 }
  0x37   : > { %s244_s17 = sshll.u32 %s236_s16, 4  ;;  %p2933_p11 = pnand %p2259_p12, %p56_p3  ;;  %s245_s17 = int_to_ptr.vmem [resolvable:$true] %s244_s17 }
  0x38   : > { %s233_s24 = scalar_lea.sflag [#allocation6], %s232_s9  ;;  %s2647_s8 = scalar_lea.vmem %s245_s17, 512 }
  0x39   : > { %p2636_p2 = pneg %p2933_p11  ;;  %p2648_p13 = scmp.ne.s32.totalorder %s245_s17, %s2647_s8 }
  0x3a   : > { %s2782_s6 = smov [#allocation5]  }
  0x3b   : > { %p2650_p0 = pnand %p2648_p13, %p2636_p2  ;;  %s2652_s1 = sshll.u32 %s2782_s6, 4  ;;  %s2653_s1 = int_to_ptr.vmem [resolvable:$false] %s2652_s1 }
  0x3c   : > { %s2654_s11 = scalar_lea.vmem %s2653_s1, 1024  ;;  %p2655_p10 = scmp.lt.s32.totalorder %s245_s17, %s2653_s1 }
  0x3d   : > { %p2651_p5 = pneg %p2650_p0  ;;  %p2656_p1 = scmp.lt.s32.totalorder %s2654_s11, %s2647_s8 }
  0x3f   : > { %p2657_p4 = por %p2656_p1, %p2655_p10 }
  0x41   : > { %p2658_p6 = pnand %p2657_p4, %p2651_p5 }
  0x43   : > { %2661 = shalt.err (!%p2658_p6)
}
  0x44   : > { %s2783_s10 = smov 64   ;;  %s2784_s13 = smov 4  }
  0x45   : > { %2249 = dma.hbm_to_vmem [thread:$0]  (!%p2933_p11), %s243_s15, 512, %s245_s17, %s233_s24, %s2783_s10, %s2783_s10, %s2784_s13  }
  0x46   : > { %256 = sbr.rel (%p2876_p8) target bundleno = 2240 (0x8c0), region = 36 }
  0x4b   : > { %s2944_s9 = sand.u32 1, %s2760_s19   ;;  %p3656_p12 = scmp.ne.s32.totalorder %s3649_s28, 0 }
  0x4c   : > { %s2102_s14 = sshll.u32 %s2944_s9, 5  ;;  %s259_s1 = scalar_lea.sflag [#allocation6], %s2944_s9 }
  0x4d   : > { %s2948_s16 = scalar_lea.vmem [#allocation5], %s2102_s14 }
  0x4e   : > { %2739 = dma.done.wait (%p3656_p12), %s259_s1, 512  }
  0x4f   : > { %2741 = vsyncadd (%p3656_p12), %s259_s1, 4294966784  ;;  %p3657_p3 = scmp.ne.s32.totalorder %s3647_s26, 0 }
  0x51   : > { %2743 = dma.done.wait (%p3657_p3), [#allocation9], 8192  }
  0x52   : > { %2745 = vsyncadd (%p3657_p3), [#allocation9], 4294959104  ;;  %s2105_s30 = sshll.u32 %s2944_s9, 6  ;;  %p2107_p8 = scmp.ne.s32.totalorder %s2768_s21, 0 }
  0x53   : > { %s2959_s15 = scalar_lea.vmem [#allocation11], %s2105_s30  ;;  %s2961_s17 = scalar_lea.vmem [#allocation12], %s2105_s30 }
  0x54   : > { %309 = sbr.rel (%p2107_p8) target bundleno = 91 (0x5b), region = 52 }
  0x59   : > { %v2785_v0 = vmov 0   ;;  %v2786_v1 = vmov 0.0  }
  0x5a   : > { %310 = vst [vmem:[#allocation3] sm:$0xf] %v2785_v0  ;;  %311 = vst [vmem:[#allocation4] sm:$0xff] %v2786_v1 }
  0x5b PF: > { %v2322_v2 = vld [vmem:[#allocation8 + $0xe4] ss:$16 sps:$4 sm:$0xff]   ;;  %v2324_v3 = vld [vmem:[#allocation8 + $0xec] ss:$16 sps:$4 sm:$0xff]   ;;  %v3644_v4 = vmov 0   ;;  %s2223_s27 = sshll.u32 %s2768_s21, 10 }
  0x5c   : > { %590 = vmatprep.mubr.bf16.mxu0 %v3644_v4  ;;  %663 = vmatprep.mubr.bf16.mxu1 %v3644_v4  ;;  %v2326_v5 = vld [vmem:[#allocation8 + $0xe0] ss:$16 sps:$4 sm:$0xff]   ;;  %v2327_v6 = vld [vmem:[#allocation8 + $0xe8] ss:$16 sps:$4 sm:$0xff]   ;;  %v2328_v7 = vld [vmem:[#allocation8 + $0xc4] ss:$16 sps:$4 sm:$0xff]   ;;  %s3546_s11 = scalar_lea.hbm %s3640_s5, %s2223_s27 }
  0x5d   : > { %558 = vmatprep.subr.bf16.mxu0 %v2322_v2  ;;  %631 = vmatprep.subr.bf16.mxu1 %v2324_v3  ;;  %v2330_v8 = vld [vmem:[#allocation8 + $0xcc] ss:$16 sps:$4 sm:$0xff]   ;;  %v2332_v9 = vld [vmem:[#allocation8 + $0xc0] ss:$16 sps:$4 sm:$0xff]   ;;  %v2333_v10 = vld [vmem:[#allocation8 + $0xc8] ss:$16 sps:$4 sm:$0xff]  }
  0x5e   : > { %559 = vmatpush1.bf16.msra.mxu0 %v2326_v5  ;;  %632 = vmatpush1.bf16.msra.mxu1 %v2327_v6  ;;  %v2334_v11 = vld [vmem:[#allocation8 + $0xa4] ss:$16 sps:$4 sm:$0xff]   ;;  %v2336_v12 = vld [vmem:[#allocation8 + $0xac] ss:$16 sps:$4 sm:$0xff]   ;;  %v2338_v13 = vld [vmem:[#allocation8 + $0xa0] ss:$16 sps:$4 sm:$0xff]  }
  0x5f   : > { %560 = vmatprep.subr.bf16.mxu0 %v2328_v7  ;;  %633 = vmatprep.subr.bf16.mxu1 %v2330_v8  ;;  %v2339_v14 = vld [vmem:[#allocation8 + $0xa8] ss:$16 sps:$4 sm:$0xff]   ;;  %v2340_v15 = vld [vmem:[#allocation8 + $0x84] ss:$16 sps:$4 sm:$0xff]   ;;  %v2342_v16 = vld [vmem:[#allocation8 + $0x8c] ss:$16 sps:$4 sm:$0xff]  }
  0x60   : > { %v2344_v17 = vld [vmem:[#allocation8 + $0x80] ss:$16 sps:$4 sm:$0xff]   ;;  %v2345_v18 = vld [vmem:[#allocation8 + $0x88] ss:$16 sps:$4 sm:$0xff]   ;;  %v2346_v19 = vld [vmem:[#allocation8 + $0x64] ss:$16 sps:$4 sm:$0xff]  }
  0x61   : > { %v2348_v20 = vld [vmem:[#allocation8 + $0x6c] ss:$16 sps:$4 sm:$0xff]   ;;  %v2350_v21 = vld [vmem:[#allocation8 + $0x60] ss:$16 sps:$4 sm:$0xff]   ;;  %v2351_v22 = vld [vmem:[#allocation8 + $0x68] ss:$16 sps:$4 sm:$0xff]  }
  0x62   : > { %561 = vmatpush1.bf16.msra.mxu0 %v2332_v9  ;;  %634 = vmatpush1.bf16.msra.mxu1 %v2333_v10  ;;  %v2352_v23 = vld [vmem:[#allocation8 + $0x44] ss:$16 sps:$4 sm:$0xff]   ;;  %v2354_v24 = vld [vmem:[#allocation8 + $0x4c] ss:$16 sps:$4 sm:$0xff]   ;;  %v2356_v25 = vld [vmem:[#allocation8 + $0x40] ss:$16 sps:$4 sm:$0xff]   ;;  %v354_v9 = vlaneseq }
  0x63   : > { %562 = vmatprep.subr.bf16.mxu0 %v2334_v11  ;;  %635 = vmatprep.subr.bf16.mxu1 %v2336_v12  ;;  %v2357_v26 = vld [vmem:[#allocation8 + $0x48] ss:$16 sps:$4 sm:$0xff]   ;;  %v2358_v27 = vld [vmem:[#allocation8 + $0x24] ss:$16 sps:$4 sm:$0xff]   ;;  %v2360_v28 = vld [vmem:[#allocation8 + $0x2c] ss:$16 sps:$4 sm:$0xff]  }
  0x64   : > { %v2362_v29 = vld [vmem:[#allocation8 + $0x20] ss:$16 sps:$4 sm:$0xff]   ;;  %v2363_v30 = vld [vmem:[#allocation8 + $0x28] ss:$16 sps:$4 sm:$0xff]   ;;  %v2364_v31 = vld [vmem:[#allocation8 + $0x4] ss:$16 sps:$4 sm:$0xff]  }
  0x65   : > { %v2366_v32 = vld [vmem:[#allocation8 + $0xc] ss:$16 sps:$4 sm:$0xff]   ;;  %v2368_v33 = vld [vmem:[#allocation8] ss:$16 sps:$4 sm:$0xff]   ;;  %v2369_v34 = vld [vmem:[#allocation8 + $0x8] ss:$16 sps:$4 sm:$0xff]  }
  0x66   : > { %563 = vmatpush1.bf16.msra.mxu0 %v2338_v13  ;;  %636 = vmatpush1.bf16.msra.mxu1 %v2339_v14  ;;  %v2966_v35 = vld [vmem:[#allocation10 + $0xe4] ss:$16 sps:$4 sm:$0xff]   ;;  %v2968_v36 = vld [vmem:[#allocation10 + $0xec] ss:$16 sps:$4 sm:$0xff]   ;;  %v2971_v38 = vld [vmem:[#allocation10 + $0xe0] ss:$16 sps:$4 sm:$0xff]  }
  0x67   : > { %564 = vmatprep.subr.bf16.mxu0 %v2340_v15  ;;  %637 = vmatprep.subr.bf16.mxu1 %v2342_v16  ;;  %v2370_v37 = vld [vmem:[%s2948_s16] sm:$0xff]   ;;  %v2973_v39 = vld [vmem:[#allocation10 + $0xe8] ss:$16 sps:$4 sm:$0xff]   ;;  %v2979_v41 = vld [vmem:[#allocation10 + $0xcc] ss:$16 sps:$4 sm:$0xff]   ;;  %v355_v10 = vshrl.u32 %v354_v9, 7 }
  0x68   : > { %v2977_v40 = vld [vmem:[#allocation10 + $0xc4] ss:$16 sps:$4 sm:$0xff]   ;;  %v2981_v42 = vld [vmem:[#allocation10 + $0xc0] ss:$16 sps:$4 sm:$0xff]   ;;  %v2985_v43 = vld [vmem:[#allocation10 + $0xc8] ss:$16 sps:$4 sm:$0xff]  }
  0x69   : > { %v2989_v44 = vld [vmem:[#allocation10 + $0xa4] ss:$16 sps:$4 sm:$0xff]   ;;  %v2991_v45 = vld [vmem:[#allocation10 + $0xac] ss:$16 sps:$4 sm:$0xff]   ;;  %v2996_v47 = vld [vmem:[#allocation10 + $0xa0] ss:$16 sps:$4 sm:$0xff]  }
  0x6a   : > { %565 = vmatpush1.bf16.msra.mxu0 %v2344_v17  ;;  %638 = vmatpush1.bf16.msra.mxu1 %v2345_v18  ;;  %v2383_v46 = vld [vmem:[%s2948_s16 + $0x8] sm:$0xff]   ;;  %v3002_v49 = vld [vmem:[#allocation10 + $0x84] ss:$16 sps:$4 sm:$0xff]   ;;  %v3008_v51 = vld [vmem:[#allocation10 + $0x80] ss:$16 sps:$4 sm:$0xff]   ;;  %v364_v11 = vsub.s32 2, %v355_v10 }
  0x6b   : > { %566 = vmatprep.subr.bf16.mxu0 %v2346_v19  ;;  %639 = vmatprep.subr.bf16.mxu1 %v2348_v20  ;;  %v2998_v48 = vld [vmem:[#allocation10 + $0xa8] ss:$16 sps:$4 sm:$0xff]   ;;  %v3006_v50 = vld [vmem:[#allocation10 + $0x8c] ss:$16 sps:$4 sm:$0xff]   ;;  %v3014_v53 = vld [vmem:[#allocation10 + $0x64] ss:$16 sps:$4 sm:$0xff]  }
  0x6c   : > { %v3010_v52 = vld [vmem:[#allocation10 + $0x88] ss:$16 sps:$4 sm:$0xff]   ;;  %v3018_v54 = vld [vmem:[#allocation10 + $0x6c] ss:$16 sps:$4 sm:$0xff]   ;;  %v2396_v55 = vld [vmem:[%s2948_s16 + $0x10] sm:$0xff]   ;;  %v356_v12 = vsub.s32 0, %v355_v10 }
  0x6d   : > { %v3025_v56 = vld [vmem:[#allocation10 + $0x60] ss:$16 sps:$4 sm:$0xff]   ;;  %v3027_v57 = vld [vmem:[#allocation10 + $0x68] ss:$16 sps:$4 sm:$0xff]   ;;  %v3031_v58 = vld [vmem:[#allocation10 + $0x44] ss:$16 sps:$4 sm:$0xff]  }
  0x6e   : > { %567 = vmatpush1.bf16.msra.mxu0 %v2350_v21  ;;  %640 = vmatpush1.bf16.msra.mxu1 %v2351_v22  ;;  %v3033_v59 = vld [vmem:[#allocation10 + $0x4c] ss:$16 sps:$4 sm:$0xff]   ;;  %v3037_v60 = vld [vmem:[#allocation10 + $0x40] ss:$16 sps:$4 sm:$0xff]   ;;  %v3039_v61 = vld [vmem:[#allocation10 + $0x48] ss:$16 sps:$4 sm:$0xff]  }
  0x6f   : > { %568 = vmatprep.subr.bf16.mxu0 %v2352_v23  ;;  %641 = vmatprep.subr.bf16.mxu1 %v2354_v24  ;;  %v3043_v62 = vld [vmem:[#allocation10 + $0x24] ss:$16 sps:$4 sm:$0xff]   ;;  %v3045_v63 = vld [vmem:[#allocation10 + $0x2c] ss:$16 sps:$4 sm:$0xff]   ;;  %v3052_v1 = vld [vmem:[#allocation10 + $0x20] ss:$16 sps:$4 sm:$0xff]  }
  0x70   : > { %v2409_v0 = vld [vmem:[%s2948_s16 + $0x18] sm:$0xff]   ;;  %v3058_v3 = vld [vmem:[#allocation10 + $0x4] ss:$16 sps:$4 sm:$0xff]   ;;  %v3064_v6 = vld [vmem:[#allocation10] ss:$16 sps:$4 sm:$0xff]   ;;  %v368_v13 = vsub.s32 3, %v355_v10 }
  0x71   : > { %v3054_v2 = vld [vmem:[#allocation10 + $0x28] ss:$16 sps:$4 sm:$0xff]   ;;  %v3060_v5 = vld [vmem:[#allocation10 + $0xc] ss:$16 sps:$4 sm:$0xff]   ;;  %v768_v8 = vld [vmem:[#allocation3] sm:$0xf] }
  0x72   : > { %569 = vmatpush1.bf16.msra.mxu0 %v2356_v25  ;;  %642 = vmatpush1.bf16.msra.mxu1 %v2357_v26  ;;  %v3066_v7 = vld [vmem:[#allocation10 + $0x8] ss:$16 sps:$4 sm:$0xff]   ;;  %v352_v14 = vld [vmem:[%s3638_s3] sm:$0xf]  ;;  %v360_v18 = vsub.s32 1, %v355_v10  ;;  %s1954_s24 = sshll.u32 %s2961_s17, 4  ;;  %s3548_s24 = int_to_ptr.vmem [resolvable:$true] %s1954_s24 }
  0x73   : > { %570 = vmatprep.subr.bf16.mxu0 %v2358_v27  ;;  %643 = vmatprep.subr.bf16.mxu1 %v2360_v28  ;;  %v3117_v17 = vrot.slane %v352_v14, %v364_v11  ;;  %v357_v21 = vrot.slane %v352_v14, %v356_v12  ;;  %v3123_v22 = vrot.slane %v352_v14, %v368_v13  ;;  %s1923_s10 = scalar_lea.sflag [#allocation13], %s2944_s9  ;;  %s2662_s13 = scalar_lea.vmem %s3548_s24, 1024 }
  0x74   : > { %v361_v25 = vrot.slane %v352_v14, %v360_v18  ;;  %p2663_p9 = scmp.ne.s32.totalorder %s3548_s24, %s2662_s13  ;;  %s2788_s14 = smov [#allocation12]  }
  0x75   : > { %s2666_s1 = sshll.u32 %s2788_s14, 4  ;;  %s2667_s1 = int_to_ptr.vmem [resolvable:$false] %s2666_s1 }
  0x76   : > { %571 = vmatpush1.bf16.msra.mxu0 %v2362_v29  ;;  %644 = vmatpush1.bf16.msra.mxu1 %v2363_v30  ;;  %p2664_p11 = pnand %p2663_p9, %p2917_p7  ;;  %s2668_s16 = scalar_lea.vmem %s2667_s1, 2048 }
  0x77   : > { %572 = vmatprep.subr.bf16.mxu0 %v2364_v31  ;;  %645 = vmatprep.subr.bf16.mxu1 %v2366_v32  ;;  %p2669_p13 = scmp.lt.s32.totalorder %s3548_s24, %s2667_s1  ;;  %p2670_p0 = scmp.lt.s32.totalorder %s2668_s16, %s2662_s13 }
  0x78   : > { %p2665_p2 = pneg %p2664_p11 }
  0x79   : > { %p2671_p5 = por %p2670_p0, %p2669_p13 }
  0x7a   : > { %573 = vmatpush1.bf16.msra.mxu0 %v2368_v33  ;;  %646 = vmatpush1.bf16.msra.mxu1 %v2369_v34 }
  0x7b   : > { %934 = vmatprep.subr.bf16.mxu0 %v2966_v35  ;;  %975 = vmatprep.subr.bf16.mxu1 %v2968_v36  ;;  %p2672_p10 = pnand %p2671_p5, %p2665_p2 }
  0x7d   : > { %591 = vmatmul.mubr.bf16.vlgmr.msra.gmra.mxu0 %v2370_v37  ;;  %664 = vmatmul.mubr.bf16.vlgmr.msra.gmra.mxu1 %v2370_v37 }
  0x7e   : > { %935 = vmatpush1.bf16.msra.mxu0 %v2971_v38  ;;  %976 = vmatpush1.bf16.msra.mxu1 %v2973_v39 }
  0x7f   : > { %936 = vmatprep.subr.bf16.mxu0 %v2977_v40  ;;  %977 = vmatprep.subr.bf16.mxu1 %v2979_v41 }
  0x80   : > { %600 = vmatprep.mubr.bf16.mxu0 %v3644_v4  ;;  %673 = vmatprep.mubr.bf16.mxu1 %v3644_v4 }
  0x82   : > { %937 = vmatpush1.bf16.msra.mxu0 %v2981_v42  ;;  %978 = vmatpush1.bf16.msra.mxu1 %v2985_v43 }
  0x83   : > { %938 = vmatprep.subr.bf16.mxu0 %v2989_v44  ;;  %979 = vmatprep.subr.bf16.mxu1 %v2991_v45 }
  0x85   : > { %601 = vmatmul.mubr.bf16.gmra.mxu0 %v2383_v46  ;;  %674 = vmatmul.mubr.bf16.gmra.mxu1 %v2383_v46 }
  0x86   : > { %939 = vmatpush1.bf16.msra.mxu0 %v2996_v47  ;;  %980 = vmatpush1.bf16.msra.mxu1 %v2998_v48 }
  0x87   : > { %940 = vmatprep.subr.bf16.mxu0 %v3002_v49  ;;  %981 = vmatprep.subr.bf16.mxu1 %v3006_v50 }
  0x88   : > { %610 = vmatprep.mubr.bf16.mxu0 %v3644_v4  ;;  %683 = vmatprep.mubr.bf16.mxu1 %v3644_v4 }
  0x8a   : > { %941 = vmatpush1.bf16.msra.mxu0 %v3008_v51  ;;  %982 = vmatpush1.bf16.msra.mxu1 %v3010_v52 }
  0x8b   : > { %942 = vmatprep.subr.bf16.mxu0 %v3014_v53  ;;  %983 = vmatprep.subr.bf16.mxu1 %v3018_v54 }
  0x8d   : > { %611 = vmatmul.mubr.bf16.gmra.mxu0 %v2396_v55  ;;  %684 = vmatmul.mubr.bf16.gmra.mxu1 %v2396_v55 }
  0x8e   : > { %943 = vmatpush1.bf16.msra.mxu0 %v3025_v56  ;;  %984 = vmatpush1.bf16.msra.mxu1 %v3027_v57 }
  0x8f   : > { %944 = vmatprep.subr.bf16.mxu0 %v3031_v58  ;;  %985 = vmatprep.subr.bf16.mxu1 %v3033_v59 }
  0x90   : > { %620 = vmatprep.mubr.bf16.mxu0 %v3644_v4  ;;  %693 = vmatprep.mubr.bf16.mxu1 %v3644_v4 }
  0x92   : > { %945 = vmatpush1.bf16.msra.mxu0 %v3037_v60  ;;  %986 = vmatpush1.bf16.msra.mxu1 %v3039_v61 }
  0x93   : > { %946 = vmatprep.subr.bf16.mxu0 %v3043_v62  ;;  %987 = vmatprep.subr.bf16.mxu1 %v3045_v63 }
  0x95   : > { %621 = vmatmul.mubr.bf16.gmra.mxu0 %v2409_v0  ;;  %694 = vmatmul.mubr.bf16.gmra.mxu1 %v2409_v0 }
  0x96   : > { %947 = vmatpush1.bf16.msra.mxu0 %v3052_v1  ;;  %988 = vmatpush1.bf16.msra.mxu1 %v3054_v2 }
  0x97   : > { %948 = vmatprep.subr.bf16.mxu0 %v3058_v3  ;;  %989 = vmatprep.subr.bf16.mxu1 %v3060_v5 }
  0x98   : > { %966 = vmatprep.mubr.bf16.mxu0 %v3644_v4  ;;  %1007 = vmatprep.mubr.bf16.mxu1 %v3644_v4 }
  0x9a   : > { %949 = vmatpush1.bf16.msra.mxu0 %v3064_v6  ;;  %990 = vmatpush1.bf16.msra.mxu1 %v3066_v7 }
  0x9b   : > { %1056 = vmatprep.subr.bf16.mxu0 %v2966_v35  ;;  %1097 = vmatprep.subr.bf16.mxu1 %v2968_v36 }
  0x9d   : > { %967 = vmatmul.mubr.bf16.vlgmr.msra.gmra.mxu0 %v768_v8  ;;  %1008 = vmatmul.mubr.bf16.vlgmr.msra.gmra.mxu1 %v768_v8 }
  0x9e   : > { %1057 = vmatpush1.bf16.msra.mxu0 %v2971_v38  ;;  %1098 = vmatpush1.bf16.msra.mxu1 %v2973_v39 }
  0x9f   : > { %1058 = vmatprep.subr.bf16.mxu0 %v2977_v40  ;;  %1099 = vmatprep.subr.bf16.mxu1 %v2979_v41 }
  0xa0   : > { %1088 = vmatprep.mubr.bf16.mxu0 %v3644_v4  ;;  %1129 = vmatprep.mubr.bf16.mxu1 %v3644_v4 }
  0xa2   : > { %1059 = vmatpush1.bf16.msra.mxu0 %v2981_v42  ;;  %1100 = vmatpush1.bf16.msra.mxu1 %v2985_v43 }
  0xa3   : > { %1060 = vmatprep.subr.bf16.mxu0 %v2989_v44  ;;  %1101 = vmatprep.subr.bf16.mxu1 %v2991_v45 }
  0xa6   : > { %1061 = vmatpush1.bf16.msra.mxu0 %v2996_v47  ;;  %1102 = vmatpush1.bf16.msra.mxu1 %v2998_v48 }
  0xa7   : > { %1062 = vmatprep.subr.bf16.mxu0 %v3002_v49  ;;  %1103 = vmatprep.subr.bf16.mxu1 %v3006_v50 }
  0xaa   : > { %1063 = vmatpush1.bf16.msra.mxu0 %v3008_v51  ;;  %1104 = vmatpush1.bf16.msra.mxu1 %v3010_v52 }
  0xab   : > { %1064 = vmatprep.subr.bf16.mxu0 %v3014_v53  ;;  %1105 = vmatprep.subr.bf16.mxu1 %v3018_v54 }
  0xae   : > { %1065 = vmatpush1.bf16.msra.mxu0 %v3025_v56  ;;  %1106 = vmatpush1.bf16.msra.mxu1 %v3027_v57 }
  0xaf   : > { %1066 = vmatprep.subr.bf16.mxu0 %v3031_v58  ;;  %1107 = vmatprep.subr.bf16.mxu1 %v3033_v59 }
  0xb2   : > { %1067 = vmatpush1.bf16.msra.mxu0 %v3037_v60  ;;  %1108 = vmatpush1.bf16.msra.mxu1 %v3039_v61 }
  0xb3   : > { %1068 = vmatprep.subr.bf16.mxu0 %v3043_v62  ;;  %1109 = vmatprep.subr.bf16.mxu1 %v3045_v63 }
  0xb6   : > { %1069 = vmatpush1.bf16.msra.mxu0 %v3052_v1  ;;  %1110 = vmatpush1.bf16.msra.mxu1 %v3054_v2 }
  0xb7   : > { %1070 = vmatprep.subr.bf16.mxu0 %v3058_v3  ;;  %1111 = vmatprep.subr.bf16.mxu1 %v3060_v5 }
  0xba   : > { %1071 = vmatpush1.bf16.msra.mxu0 %v3064_v6  ;;  %1112 = vmatpush1.bf16.msra.mxu1 %v3066_v7 }
  0xbb   : > { %1180 = vmatprep.subr.bf16.mxu0 %v2966_v35  ;;  %1221 = vmatprep.subr.bf16.mxu1 %v2968_v36 }
 0x13d   : > { %v3113_v15 = vpop.f32.mrf.mxu0  ;;  %v3115_v16 = vpop.f32.mrf.mxu1 }
 0x13f   : > { %v3119_v19 = vpop.f32.mrf.mxu0  ;;  %v3121_v20 = vpop.f32.mrf.mxu1 }
 0x141   : > { %v596_v23 = vpop.f32.mrf.mxu0  ;;  %v669_v24 = vpop.f32.mrf.mxu1 }
 0x142   : > { %v3125_v26 = vadd.f32 %v596_v23, %v357_v21  ;;  %v3128_v27 = vadd.f32 %v669_v24, %v3117_v17 }
 0x143   : > { %v598_v28 = vpop.f32.mrf.mxu0  ;;  %v671_v29 = vpop.f32.mrf.mxu1 }
 0x144   : > { %v3130_v30 = vadd.f32 %v598_v28, %v361_v25  ;;  %v3133_v31 = vadd.f32 %v671_v29, %v3123_v22 }
 0x145   : > { %v602_v32 = vpop.f32.mrf.mxu0  ;;  %v675_v33 = vpop.f32.mrf.mxu1 }
 0x146   : > { %v3135_v34 = vadd.f32 %v602_v32, %v357_v21  ;;  %v3138_v37 = vadd.f32 %v675_v33, %v3117_v17 }
 0x147   : > { %v604_v46 = vpop.f32.mrf.mxu0  ;;  %v677_v55 = vpop.f32.mrf.mxu1 }
 0x148   : > { %3658 = vst [vmem:[#allocation18_spill] sm:$0xff] %v3138_v37  ;;  %v3140_v0 = vadd.f32 %v604_v46, %v361_v25  ;;  %v3143_v8 = vadd.f32 %v677_v55, %v3123_v22 }
 0x149   : > { %v606_v9 = vpop.f32.mrf.mxu0  ;;  %v679_v10 = vpop.f32.mrf.mxu1 }
 0x14a   : > { %v3145_v11 = vadd.f32 %v606_v9, %v357_v21  ;;  %v3148_v12 = vadd.f32 %v679_v10, %v3117_v17 }
 0x14b   : > { %v608_v13 = vpop.f32.mrf.mxu0  ;;  %v681_v14 = vpop.f32.mrf.mxu1 }
 0x14c   : > { %3659 = vst [vmem:[#allocation19_spill] sm:$0xff] %v3145_v11  ;;  %3660 = vst [vmem:[#allocation20_spill] sm:$0xff] %v3148_v12  ;;  %v3150_v18 = vadd.f32 %v608_v13, %v361_v25  ;;  %v3153_v23 = vadd.f32 %v681_v14, %v3123_v22 }
 0x14d   : > { %v612_v24 = vpop.f32.mrf.mxu0  ;;  %v685_v28 = vpop.f32.mrf.mxu1 }
 0x14e   : > { %3661 = vst [vmem:[#allocation21_spill] sm:$0xff] %v3150_v18  ;;  %3662 = vst [vmem:[#allocation22_spill] sm:$0xff] %v3153_v23  ;;  %v3155_v29 = vadd.f32 %v612_v24, %v357_v21  ;;  %v3158_v32 = vadd.f32 %v685_v28, %v3117_v17 }
 0x14f   : > { %v614_v33 = vpop.f32.mrf.mxu0  ;;  %v687_v46 = vpop.f32.mrf.mxu1 }
 0x150   : > { %3663 = vst [vmem:[#allocation23_spill] sm:$0xff] %v3155_v29  ;;  %3664 = vst [vmem:[#allocation24_spill] sm:$0xff] %v3158_v32  ;;  %v3160_v55 = vadd.f32 %v614_v33, %v361_v25  ;;  %v3163_v9 = vadd.f32 %v687_v46, %v3123_v22 }
 0x151   : > { %v616_v10 = vpop.f32.mrf.mxu0  ;;  %v689_v13 = vpop.f32.mrf.mxu1 }
 0x152   : > { %3665 = vst [vmem:[#allocation25_spill] sm:$0xff] %v3160_v55  ;;  %3666 = vst [vmem:[#allocation26_spill] sm:$0xff] %v3163_v9  ;;  %v3165_v4 = vadd.f32 %v616_v10, %v357_v21  ;;  %v3168_v14 = vadd.f32 %v689_v13, %v3117_v17 }
 0x153   : > { %v618_v12 = vpop.f32.mrf.mxu0  ;;  %v691_v24 = vpop.f32.mrf.mxu1 }
 0x154   : > { %3667 = vst [vmem:[#allocation27_spill] sm:$0xff] %v3165_v4  ;;  %3668 = vst [vmem:[#allocation28_spill] sm:$0xff] %v3168_v14  ;;  %v3170_v29 = vadd.f32 %v618_v12, %v361_v25  ;;  %v3173_v28 = vadd.f32 %v691_v24, %v3123_v22 }
 0x155   : > { %v622_v32 = vpop.f32.mrf.mxu0  ;;  %v695_v33 = vpop.f32.mrf.mxu1 }
 0x156   : > { %3669 = vst [vmem:[#allocation29_spill] sm:$0xff] %v3170_v29  ;;  %3670 = vst [vmem:[#allocation30_spill] sm:$0xff] %v3173_v28  ;;  %v3175_v55 = vadd.f32 %v622_v32, %v357_v21  ;;  %v3178_v46 = vadd.f32 %v695_v33, %v3117_v17 }
 0x157   : > { %v624_v9 = vpop.f32.mrf.mxu0  ;;  %v697_v10 = vpop.f32.mrf.mxu1 }
 0x158   : > { %3671 = vst [vmem:[#allocation31_spill] sm:$0xff] %v3175_v55  ;;  %3672 = vst [vmem:[#allocation32_spill] sm:$0xff] %v3178_v46  ;;  %v3180_v4 = vadd.f32 %v624_v9, %v361_v25  ;;  %v3183_v13 = vadd.f32 %v697_v10, %v3123_v22  ;;  %v593_v55 = vadd.f32 %v3113_v15, %v357_v21 }
 0x159   : > { %v626_v14 = vpop.f32.mrf.mxu0  ;;  %v699_v12 = vpop.f32.mrf.mxu1  ;;  %v595_v10 = vadd.f32 %v3119_v19, %v361_v25 }
 0x15a   : > { %3673 = vst [vmem:[#allocation33_spill] sm:$0xff] %v3180_v4  ;;  %3674 = vst [vmem:[#allocation34_spill] sm:$0xff] %v3183_v13  ;;  %v3185_v29 = vadd.f32 %v626_v14, %v357_v21  ;;  %v3188_v24 = vadd.f32 %v699_v12, %v3117_v17  ;;  %v668_v21 = vadd.f32 %v3121_v20, %v3123_v22 }
 0x15b   : > { %v628_v28 = vpop.f32.mrf.mxu0  ;;  %v701_v32 = vpop.f32.mrf.mxu1 }
 0x15c   : > { %3675 = vst [vmem:[#allocation35_spill] sm:$0xff] %v3185_v29  ;;  %3676 = vst [vmem:[#allocation36_spill] sm:$0xff] %v3188_v24  ;;  %v3191_v33 = vadd.f32 %v628_v28, %v361_v25  ;;  %v3194_v46 = vadd.f32 %v701_v32, %v3123_v22  ;;  %v666_v32 = vadd.f32 %v3115_v16, %v3117_v17 }
 0x15d   : > { %v968_v9 = vpop.f32.mrf.mxu0  ;;  %v1009_v4 = vpop.f32.mrf.mxu1 }
 0x15e   : > { %v1016_v13 = vadd.f32 %v968_v9, %v593_v55  ;;  %v1018_v55 = vadd.f32 %v1009_v4, %v666_v32 }
 0x15f   : > { %v970_v23 = vpop.f32.mrf.mxu0  ;;  %v1011_v14 = vpop.f32.mrf.mxu1 }
 0x160   : > { %v2176_v29 = vmul.f32 -1.442695, %v1016_v13  ;;  %v1017_v18 = vadd.f32 %v970_v23, %v595_v10  ;;  %v1019_v28 = vadd.f32 %v1011_v14, %v668_v21  ;;  %v3677_v21 = vmov 0  }
 0x161   : > { %v972_v12 = vpop.f32.mrf.mxu0  ;;  %v1013_v24 = vpop.f32.mrf.mxu1 }
 0x162   : > { %2422 = vpow2.f32 %v2176_v29  ;;  %v2177_v11 = vmul.f32 -1.442695, %v1017_v18  ;;  %v2178_v19 = vmul.f32 -1.442695, %v1019_v28  ;;  %v769_v18 = vld [vmem:[#allocation4] sm:$0xff] }
 0x163   : > { %v973_v37 = vpop.f32.mrf.mxu0  ;;  %v1014_v15 = vpop.f32.mrf.mxu1 }
 0x164   : > { %2424 = vpow2.f32 %v2177_v11 }
 0x165   : > { %2426 = vpow2.f32 %v2178_v19 }
 0x16f   : > { %v2423_v25 = vpop.eup %2422 }
 0x170   : > { %v1023_v9 = vadd.f32 1.0, %v2423_v25 }
 0x171   : > { %v2425_v13 = vpop.eup %2424 }
 0x172   : > { %2428 = vrcp.f32 %v1023_v9  ;;  %v1029_v23 = vadd.f32 1.0, %v2425_v13  ;;  %v2427_v37 = vpop.eup %2426 }
 0x173   : > { %2430 = vtanh.f32 %v1018_v55  ;;  %v1036_v29 = vadd.f32 1.0, %v2427_v37 }
 0x174   : > { %2432 = vrcp.f32 %v1029_v23 }
 0x175   : > { %2434 = vrcp.f32 %v1036_v29 }
 0x17f   : > { %v2429_v11 = vpop.eup %2428 }
 0x180   : > { %v2431_v20 = vpop.eup %2430 }
 0x181   : > { %v2433_v22 = vpop.eup %2432  ;;  %v1040_v24 = vmul.f32 %v2431_v20, %v2429_v11 }
 0x182   : > { %v1039_v16 = vmul.f32 %v2433_v22, %v769_v18  ;;  %v2435_v4 = vpop.eup %2434 }
 0x184   : > { %v3201_v17 = vadd.f32 %v1040_v24, %v1039_v16 }
 0x186   : > { %2436 = vtanh.f32 %v3201_v17  ;;  %1048 = vst [vmem:[%s2961_s17] sm:$0xff] %v3201_v17 }
 0x193   : > { %v2437_v10 = vpop.eup %2436 }
 0x194   : > { %v1043_v14 = vmul.f32 %v2437_v10, %v2435_v4 }
 0x196   : > { %v1044_v12 = vpack.c.bf16 %v1043_v14, %v1043_v14  ;;  %1047 = vst [vmem:[%s2959_s15] sm:$0xff] %v1043_v14 }
 0x198   : > { %1045 = vst [vmem:[#allocation3] sm:$0xf] %v1044_v12 }
 0x19f   : > { %v1049_v15 = vld [vmem:[#allocation3] sm:$0xf] }
 0x1a0   : > { %1089 = vmatmul.mubr.bf16.vlgmr.msra.gmra.mxu0 %v1049_v15  ;;  %1130 = vmatmul.mubr.bf16.vlgmr.msra.gmra.mxu1 %v1049_v15 }
 0x1a1   : > { %1181 = vmatpush1.bf16.msra.mxu0 %v2971_v38  ;;  %1222 = vmatpush1.bf16.msra.mxu1 %v2973_v39 }
 0x1a2   : > { %1182 = vmatprep.subr.bf16.mxu0 %v2977_v40  ;;  %1223 = vmatprep.subr.bf16.mxu1 %v2979_v41 }
 0x1a3   : > { %1212 = vmatprep.mubr.bf16.mxu0 %v3677_v21  ;;  %1253 = vmatprep.mubr.bf16.mxu1 %v3677_v21 }
 0x1a5   : > { %1183 = vmatpush1.bf16.msra.mxu0 %v2981_v42  ;;  %1224 = vmatpush1.bf16.msra.mxu1 %v2985_v43 }
 0x1a6   : > { %1184 = vmatprep.subr.bf16.mxu0 %v2989_v44  ;;  %1225 = vmatprep.subr.bf16.mxu1 %v2991_v45 }
 0x1a9   : > { %1185 = vmatpush1.bf16.msra.mxu0 %v2996_v47  ;;  %1226 = vmatpush1.bf16.msra.mxu1 %v2998_v48 }
 0x1aa   : > { %1186 = vmatprep.subr.bf16.mxu0 %v3002_v49  ;;  %1227 = vmatprep.subr.bf16.mxu1 %v3006_v50 }
 0x1ad   : > { %1187 = vmatpush1.bf16.msra.mxu0 %v3008_v51  ;;  %1228 = vmatpush1.bf16.msra.mxu1 %v3010_v52 }
 0x1ae   : > { %1188 = vmatprep.subr.bf16.mxu0 %v3014_v53  ;;  %1229 = vmatprep.subr.bf16.mxu1 %v3018_v54 }
 0x1b1   : > { %1189 = vmatpush1.bf16.msra.mxu0 %v3025_v56  ;;  %1230 = vmatpush1.bf16.msra.mxu1 %v3027_v57 }
 0x1b2   : > { %1190 = vmatprep.subr.bf16.mxu0 %v3031_v58  ;;  %1231 = vmatprep.subr.bf16.mxu1 %v3033_v59 }
 0x1b5   : > { %1191 = vmatpush1.bf16.msra.mxu0 %v3037_v60  ;;  %1232 = vmatpush1.bf16.msra.mxu1 %v3039_v61 }
 0x1b6   : > { %1192 = vmatprep.subr.bf16.mxu0 %v3043_v62  ;;  %1233 = vmatprep.subr.bf16.mxu1 %v3045_v63 }
 0x1b9   : > { %1193 = vmatpush1.bf16.msra.mxu0 %v3052_v1  ;;  %1234 = vmatpush1.bf16.msra.mxu1 %v3054_v2 }
 0x1ba   : > { %1194 = vmatprep.subr.bf16.mxu0 %v3058_v3  ;;  %1235 = vmatprep.subr.bf16.mxu1 %v3060_v5 }
 0x1bd   : > { %1195 = vmatpush1.bf16.msra.mxu0 %v3064_v6  ;;  %1236 = vmatpush1.bf16.msra.mxu1 %v3066_v7 }
 0x1be   : > { %1304 = vmatprep.subr.bf16.mxu0 %v2966_v35  ;;  %1345 = vmatprep.subr.bf16.mxu1 %v2968_v36 }
 0x260   : > { %v1090_v28 = vpop.f32.mrf.mxu0  ;;  %v1131_v32 = vpop.f32.mrf.mxu1 }
 0x261   : > { %v1138_v19 = vadd.f32 %v1090_v28, %v3125_v26  ;;  %v1140_v29 = vadd.f32 %v1131_v32, %v3128_v27 }
 0x262   : > { %v1092_v25 = vpop.f32.mrf.mxu0  ;;  %v1133_v55 = vpop.f32.mrf.mxu1 }
 0x263   : > { %v2179_v9 = vmul.f32 -1.442695, %v1138_v19  ;;  %v1139_v13 = vadd.f32 %v1092_v25, %v3130_v30  ;;  %v1141_v22 = vadd.f32 %v1133_v55, %v3133_v31 }
 0x264   : > { %v1094_v23 = vpop.f32.mrf.mxu0  ;;  %v1135_v37 = vpop.f32.mrf.mxu1 }
 0x265   : > { %2438 = vpow2.f32 %v2179_v9  ;;  %v2180_v11 = vmul.f32 -1.442695, %v1139_v13  ;;  %v2181_v24 = vmul.f32 -1.442695, %v1141_v22 }
 0x266   : > { %v1095_v18 = vpop.f32.mrf.mxu0  ;;  %v1136_v20 = vpop.f32.mrf.mxu1 }
 0x267   : > { %2440 = vpow2.f32 %v2180_v11 }
 0x268   : > { %2442 = vtanh.f32 %v1140_v29 }
 0x269   : > { %2444 = vpow2.f32 %v2181_v24 }
 0x272   : > { %v2439_v16 = vpop.eup %2438 }
 0x273   : > { %v1145_v4 = vadd.f32 1.0, %v2439_v16 }
 0x274   : > { %v2441_v26 = vpop.eup %2440 }
 0x275   : > { %2446 = vrcp.f32 %v1145_v4  ;;  %v1151_v30 = vadd.f32 1.0, %v2441_v26  ;;  %v2443_v10 = vpop.eup %2442 }
 0x276   : > { %v2445_v14 = vpop.eup %2444 }
 0x277   : > { %2448 = vrcp.f32 %v1151_v30  ;;  %v1158_v19 = vadd.f32 1.0, %v2445_v14 }
 0x279   : > { %2450 = vrcp.f32 %v1158_v19 }
 0x282   : > { %v2447_v12 = vpop.eup %2446 }
 0x283   : > { %v1162_v15 = vmul.f32 %v2447_v12, %v2443_v10  ;;  %v3678_v10 = vld [vmem:[#allocation18_spill] sm:$0xff] }
 0x284   : > { %v2449_v28 = vpop.eup %2448 }
 0x285   : > { %v1161_v31 = vmul.f32 %v2449_v28, %v3201_v17 }
 0x286   : > { %v2451_v32 = vpop.eup %2450 }
 0x287   : > { %v3246_v27 = vadd.f32 %v1162_v15, %v1161_v31 }
 0x289   : > { %2452 = vtanh.f32 %v3246_v27  ;;  %2183 = vst [vmem:[%s2961_s17 + $0x8] sm:$0xff] %v3246_v27 }
 0x296   : > { %v2453_v25 = vpop.eup %2452 }
 0x297   : > { %v1165_v55 = vmul.f32 %v2453_v25, %v2451_v32 }
 0x299   : > { %v1166_v9 = vpack.c.bf16 %v1165_v55, %v1165_v55  ;;  %2182 = vst [vmem:[%s2959_s15 + $0x8] sm:$0xff] %v1165_v55 }
 0x29b   : > { %1167 = vst [vmem:[#allocation3] sm:$0xf] %v1166_v9 }
 0x2a2   : > { %v1173_v13 = vld [vmem:[#allocation3] sm:$0xf] }
 0x2a3   : > { %1213 = vmatmul.mubr.bf16.vlgmr.msra.gmra.mxu0 %v1173_v13  ;;  %1254 = vmatmul.mubr.bf16.vlgmr.msra.gmra.mxu1 %v1173_v13 }
 0x2a4   : > { %1305 = vmatpush1.bf16.msra.mxu0 %v2971_v38  ;;  %1346 = vmatpush1.bf16.msra.mxu1 %v2973_v39 }
 0x2a5   : > { %1306 = vmatprep.subr.bf16.mxu0 %v2977_v40  ;;  %1347 = vmatprep.subr.bf16.mxu1 %v2979_v41 }
 0x2a6   : > { %1336 = vmatprep.mubr.bf16.mxu0 %v3677_v21  ;;  %1377 = vmatprep.mubr.bf16.mxu1 %v3677_v21 }
 0x2a8   : > { %1307 = vmatpush1.bf16.msra.mxu0 %v2981_v42  ;;  %1348 = vmatpush1.bf16.msra.mxu1 %v2985_v43 }
 0x2a9   : > { %1308 = vmatprep.subr.bf16.mxu0 %v2989_v44  ;;  %1349 = vmatprep.subr.bf16.mxu1 %v2991_v45 }
 0x2ac   : > { %1309 = vmatpush1.bf16.msra.mxu0 %v2996_v47  ;;  %1350 = vmatpush1.bf16.msra.mxu1 %v2998_v48 }
 0x2ad   : > { %1310 = vmatprep.subr.bf16.mxu0 %v3002_v49  ;;  %1351 = vmatprep.subr.bf16.mxu1 %v3006_v50 }
 0x2b0   : > { %1311 = vmatpush1.bf16.msra.mxu0 %v3008_v51  ;;  %1352 = vmatpush1.bf16.msra.mxu1 %v3010_v52 }
 0x2b1   : > { %1312 = vmatprep.subr.bf16.mxu0 %v3014_v53  ;;  %1353 = vmatprep.subr.bf16.mxu1 %v3018_v54 }
 0x2b4   : > { %1313 = vmatpush1.bf16.msra.mxu0 %v3025_v56  ;;  %1354 = vmatpush1.bf16.msra.mxu1 %v3027_v57 }
 0x2b5   : > { %1314 = vmatprep.subr.bf16.mxu0 %v3031_v58  ;;  %1355 = vmatprep.subr.bf16.mxu1 %v3033_v59 }
 0x2b8   : > { %1315 = vmatpush1.bf16.msra.mxu0 %v3037_v60  ;;  %1356 = vmatpush1.bf16.msra.mxu1 %v3039_v61 }
 0x2b9   : > { %1316 = vmatprep.subr.bf16.mxu0 %v3043_v62  ;;  %1357 = vmatprep.subr.bf16.mxu1 %v3045_v63 }
 0x2bc   : > { %1317 = vmatpush1.bf16.msra.mxu0 %v3052_v1  ;;  %1358 = vmatpush1.bf16.msra.mxu1 %v3054_v2 }
 0x2bd   : > { %1318 = vmatprep.subr.bf16.mxu0 %v3058_v3  ;;  %1359 = vmatprep.subr.bf16.mxu1 %v3060_v5 }
 0x2c0   : > { %1319 = vmatpush1.bf16.msra.mxu0 %v3064_v6  ;;  %1360 = vmatpush1.bf16.msra.mxu1 %v3066_v7 }
 0x2c1   : > { %1428 = vmatprep.subr.bf16.mxu0 %v2966_v35  ;;  %1469 = vmatprep.subr.bf16.mxu1 %v2968_v36 }
 0x363   : > { %v1214_v17 = vpop.f32.mrf.mxu0  ;;  %v1255_v23 = vpop.f32.mrf.mxu1 }
 0x364   : > { %v1262_v37 = vadd.f32 %v1214_v17, %v3135_v34  ;;  %v1264_v14 = vadd.f32 %v1255_v23, %v3678_v10 }
 0x365   : > { %v1216_v11 = vpop.f32.mrf.mxu0  ;;  %v1257_v18 = vpop.f32.mrf.mxu1 }
 0x366   : > { %v2184_v20 = vmul.f32 -1.442695, %v1262_v37  ;;  %v1263_v22 = vadd.f32 %v1216_v11, %v3140_v0  ;;  %v1265_v30 = vadd.f32 %v1257_v18, %v3143_v8 }
 0x367   : > { %v1218_v29 = vpop.f32.mrf.mxu0  ;;  %v1259_v24 = vpop.f32.mrf.mxu1 }
 0x368   : > { %2454 = vpow2.f32 %v2184_v20  ;;  %v2185_v16 = vmul.f32 -1.442695, %v1263_v22  ;;  %v2186_v12 = vmul.f32 -1.442695, %v1265_v30  ;;  %v3679_v22 = vld [vmem:[#allocation19_spill] sm:$0xff] }
 0x369   : > { %v1219_v4 = vpop.f32.mrf.mxu0  ;;  %v1260_v26 = vpop.f32.mrf.mxu1 }
 0x36a   : > { %2456 = vpow2.f32 %v2185_v16  ;;  %v3680_v26 = vld [vmem:[#allocation21_spill] sm:$0xff] }
 0x36b   : > { %2458 = vtanh.f32 %v1264_v14 }
 0x36c   : > { %2460 = vpow2.f32 %v2186_v12 }
 0x375   : > { %v2455_v15 = vpop.eup %2454 }
 0x376   : > { %v1269_v28 = vadd.f32 1.0, %v2455_v15 }
 0x377   : > { %v2457_v34 = vpop.eup %2456 }
 0x378   : > { %2462 = vrcp.f32 %v1269_v28  ;;  %v1275_v0 = vadd.f32 1.0, %v2457_v34  ;;  %v2459_v19 = vpop.eup %2458  ;;  %v3681_v34 = vld [vmem:[#allocation22_spill] sm:$0xff] }
 0x379   : > { %v2461_v31 = vpop.eup %2460 }
 0x37a   : > { %2464 = vrcp.f32 %v1275_v0  ;;  %v1282_v9 = vadd.f32 1.0, %v2461_v31  ;;  %v3682_v0 = vld [vmem:[#allocation20_spill] sm:$0xff] }
 0x37c   : > { %2466 = vrcp.f32 %v1282_v9 }
 0x385   : > { %v2463_v32 = vpop.eup %2462 }
 0x386   : > { %v1286_v25 = vmul.f32 %v2463_v32, %v2459_v19 }
 0x387   : > { %v2465_v55 = vpop.eup %2464 }
 0x388   : > { %v1285_v8 = vmul.f32 %v2465_v55, %v3246_v27 }
 0x389   : > { %v2467_v17 = vpop.eup %2466 }
 0x38a   : > { %v3291_v13 = vadd.f32 %v1286_v25, %v1285_v8 }
 0x38c   : > { %2468 = vtanh.f32 %v3291_v13  ;;  %2188 = vst [vmem:[%s2961_s17 + $0x10] sm:$0xff] %v3291_v13 }
 0x399   : > { %v2469_v23 = vpop.eup %2468 }
 0x39a   : > { %v1289_v37 = vmul.f32 %v2469_v23, %v2467_v17 }
 0x39c   : > { %v1290_v11 = vpack.c.bf16 %v1289_v37, %v1289_v37  ;;  %2187 = vst [vmem:[%s2959_s15 + $0x10] sm:$0xff] %v1289_v37 }
 0x39e   : > { %1291 = vst [vmem:[#allocation3] sm:$0xf] %v1290_v11 }
 0x3a5   : > { %v1297_v18 = vld [vmem:[#allocation3] sm:$0xf] }
 0x3a6   : > { %1337 = vmatmul.mubr.bf16.vlgmr.msra.gmra.mxu0 %v1297_v18  ;;  %1378 = vmatmul.mubr.bf16.vlgmr.msra.gmra.mxu1 %v1297_v18 }
 0x3a7   : > { %1429 = vmatpush1.bf16.msra.mxu0 %v2971_v38  ;;  %1470 = vmatpush1.bf16.msra.mxu1 %v2973_v39 }
 0x3a8   : > { %1430 = vmatprep.subr.bf16.mxu0 %v2977_v40  ;;  %1471 = vmatprep.subr.bf16.mxu1 %v2979_v41 }
 0x3a9   : > { %1460 = vmatprep.mubr.bf16.mxu0 %v3677_v21  ;;  %1501 = vmatprep.mubr.bf16.mxu1 %v3677_v21 }
 0x3ab   : > { %1431 = vmatpush1.bf16.msra.mxu0 %v2981_v42  ;;  %1472 = vmatpush1.bf16.msra.mxu1 %v2985_v43 }
 0x3ac   : > { %1432 = vmatprep.subr.bf16.mxu0 %v2989_v44  ;;  %1473 = vmatprep.subr.bf16.mxu1 %v2991_v45 }
 0x3af   : > { %1433 = vmatpush1.bf16.msra.mxu0 %v2996_v47  ;;  %1474 = vmatpush1.bf16.msra.mxu1 %v2998_v48 }
 0x3b0   : > { %1434 = vmatprep.subr.bf16.mxu0 %v3002_v49  ;;  %1475 = vmatprep.subr.bf16.mxu1 %v3006_v50 }
 0x3b3   : > { %1435 = vmatpush1.bf16.msra.mxu0 %v3008_v51  ;;  %1476 = vmatpush1.bf16.msra.mxu1 %v3010_v52 }
 0x3b4   : > { %1436 = vmatprep.subr.bf16.mxu0 %v3014_v53  ;;  %1477 = vmatprep.subr.bf16.mxu1 %v3018_v54 }
 0x3b7   : > { %1437 = vmatpush1.bf16.msra.mxu0 %v3025_v56  ;;  %1478 = vmatpush1.bf16.msra.mxu1 %v3027_v57 }
 0x3b8   : > { %1438 = vmatprep.subr.bf16.mxu0 %v3031_v58  ;;  %1479 = vmatprep.subr.bf16.mxu1 %v3033_v59 }
 0x3bb   : > { %1439 = vmatpush1.bf16.msra.mxu0 %v3037_v60  ;;  %1480 = vmatpush1.bf16.msra.mxu1 %v3039_v61 }
 0x3bc   : > { %1440 = vmatprep.subr.bf16.mxu0 %v3043_v62  ;;  %1481 = vmatprep.subr.bf16.mxu1 %v3045_v63 }
 0x3bf   : > { %1441 = vmatpush1.bf16.msra.mxu0 %v3052_v1  ;;  %1482 = vmatpush1.bf16.msra.mxu1 %v3054_v2 }
 0x3c0   : > { %1442 = vmatprep.subr.bf16.mxu0 %v3058_v3  ;;  %1483 = vmatprep.subr.bf16.mxu1 %v3060_v5 }
 0x3c3   : > { %1443 = vmatpush1.bf16.msra.mxu0 %v3064_v6  ;;  %1484 = vmatpush1.bf16.msra.mxu1 %v3066_v7 }
 0x3c4   : > { %1552 = vmatprep.subr.bf16.mxu0 %v2966_v35  ;;  %1593 = vmatprep.subr.bf16.mxu1 %v2968_v36 }
 0x466   : > { %v1338_v27 = vpop.f32.mrf.mxu0  ;;  %v1379_v20 = vpop.f32.mrf.mxu1 }
 0x467   : > { %v1386_v29 = vadd.f32 %v1338_v27, %v3679_v22  ;;  %v1388_v36 = vadd.f32 %v1379_v20, %v3682_v0  ;;  %v3400_v0 = vld [vmem:[#allocation10 + $0xcc] ss:$16 sps:$4 sm:$0xff]  }
 0x468   : > { %v1340_v24 = vpop.f32.mrf.mxu0  ;;  %v1381_v16 = vpop.f32.mrf.mxu1 }
 0x469   : > { %v2189_v4 = vmul.f32 -1.442695, %v1386_v29  ;;  %v1387_v30 = vadd.f32 %v1340_v24, %v3680_v26  ;;  %v1389_v35 = vadd.f32 %v1381_v16, %v3681_v34  ;;  %v3394_v34 = vld [vmem:[#allocation10 + $0xe8] ss:$16 sps:$4 sm:$0xff]  }
 0x46a   : > { %v1342_v10 = vpop.f32.mrf.mxu0  ;;  %v1383_v14 = vpop.f32.mrf.mxu1 }
 0x46b   : > { %2470 = vpow2.f32 %v2189_v4  ;;  %v2190_v12 = vmul.f32 -1.442695, %v1387_v30  ;;  %v2191_v19 = vmul.f32 -1.442695, %v1389_v35  ;;  %v3397_v35 = vld [vmem:[#allocation10 + $0xc4] ss:$16 sps:$4 sm:$0xff]  }
 0x46c   : > { %v1343_v15 = vpop.f32.mrf.mxu0  ;;  %v1384_v28 = vpop.f32.mrf.mxu1 }
 0x46d   : > { %2472 = vpow2.f32 %v2190_v12  ;;  %v3391_v28 = vld [vmem:[#allocation10 + $0xe0] ss:$16 sps:$4 sm:$0xff]  }
 0x46e   : > { %2474 = vtanh.f32 %v1388_v36  ;;  %v3405_v36 = vld [vmem:[#allocation10 + $0xc0] ss:$16 sps:$4 sm:$0xff]  }
 0x46f   : > { %2476 = vpow2.f32 %v2191_v19  ;;  %v3408_v19 = vld [vmem:[#allocation10 + $0xc8] ss:$16 sps:$4 sm:$0xff]  }
 0x478   : > { %v2471_v31 = vpop.eup %2470 }
 0x479   : > { %v1393_v32 = vadd.f32 1.0, %v2471_v31  ;;  %v3411_v31 = vld [vmem:[#allocation10 + $0xa4] ss:$16 sps:$4 sm:$0xff]  }
 0x47a   : > { %v2473_v25 = vpop.eup %2472 }
 0x47b   : > { %2478 = vrcp.f32 %v1393_v32  ;;  %v1399_v55 = vadd.f32 1.0, %v2473_v25  ;;  %v2475_v9 = vpop.eup %2474  ;;  %v3414_v32 = vld [vmem:[#allocation10 + $0xac] ss:$16 sps:$4 sm:$0xff]   ;;  %v3417_v25 = vld [vmem:[#allocation10 + $0xa0] ss:$16 sps:$4 sm:$0xff]  }
 0x47c   : > { %v2477_v8 = vpop.eup %2476 }
 0x47d   : > { %2480 = vrcp.f32 %v1399_v55  ;;  %v1406_v11 = vadd.f32 1.0, %v2477_v8  ;;  %v3420_v55 = vld [vmem:[#allocation10 + $0xa8] ss:$16 sps:$4 sm:$0xff]   ;;  %v3426_v8 = vld [vmem:[#allocation10 + $0x8c] ss:$16 sps:$4 sm:$0xff]  }
 0x47f   : > { %2482 = vrcp.f32 %v1406_v11  ;;  %v3438_v11 = vld [vmem:[#allocation10 + $0x6c] ss:$16 sps:$4 sm:$0xff]  }
 0x488   : > { %v2479_v17 = vpop.eup %2478 }
 0x489   : > { %v1410_v23 = vmul.f32 %v2479_v17, %v2475_v9  ;;  %v3423_v9 = vld [vmem:[#allocation10 + $0x84] ss:$16 sps:$4 sm:$0xff]   ;;  %v3429_v17 = vld [vmem:[#allocation10 + $0x80] ss:$16 sps:$4 sm:$0xff]  }
 0x48a   : > { %v2481_v37 = vpop.eup %2480 }
 0x48b   : > { %v1409_v18 = vmul.f32 %v2481_v37, %v3291_v13  ;;  %v3435_v37 = vld [vmem:[#allocation10 + $0x64] ss:$16 sps:$4 sm:$0xff]  }
 0x48c   : > { %v2483_v20 = vpop.eup %2482 }
 0x48d   : > { %v3336_v27 = vadd.f32 %v1410_v23, %v1409_v18  ;;  %v3432_v23 = vld [vmem:[#allocation10 + $0x88] ss:$16 sps:$4 sm:$0xff]   ;;  %v3441_v18 = vld [vmem:[#allocation10 + $0x60] ss:$16 sps:$4 sm:$0xff]  }
 0x48f   : > { %2484 = vtanh.f32 %v3336_v27  ;;  %2193 = vst [vmem:[%s2961_s17 + $0x18] sm:$0xff] %v3336_v27 }
 0x49c   : > { %v2485_v22 = vpop.eup %2484 }
 0x49d   : > { %v1413_v29 = vmul.f32 %v2485_v22, %v2483_v20  ;;  %v3447_v20 = vld [vmem:[#allocation10 + $0x44] ss:$16 sps:$4 sm:$0xff]   ;;  %v3450_v22 = vld [vmem:[#allocation10 + $0x4c] ss:$16 sps:$4 sm:$0xff]  }
 0x49f   : > { %v1414_v24 = vpack.c.bf16 %v1413_v29, %v1413_v29  ;;  %2192 = vst [vmem:[%s2959_s15 + $0x18] sm:$0xff] %v1413_v29  ;;  %v3453_v29 = vld [vmem:[#allocation10 + $0x40] ss:$16 sps:$4 sm:$0xff]  }
 0x4a1   : > { %1415 = vst [vmem:[#allocation3] sm:$0xf] %v1414_v24  ;;  %v3456_v24 = vld [vmem:[#allocation10 + $0x48] ss:$16 sps:$4 sm:$0xff]  }
 0x4a8   : > { %v1421_v16 = vld [vmem:[#allocation3] sm:$0xf] }
 0x4a9   : > { %1461 = vmatmul.mubr.bf16.vlgmr.msra.gmra.mxu0 %v1421_v16  ;;  %1502 = vmatmul.mubr.bf16.vlgmr.msra.gmra.mxu1 %v1421_v16  ;;  %v3459_v16 = vld [vmem:[#allocation10 + $0x24] ss:$16 sps:$4 sm:$0xff]  }
 0x4aa   : > { %1553 = vmatpush1.bf16.msra.mxu0 %v2971_v38  ;;  %1594 = vmatpush1.bf16.msra.mxu1 %v2973_v39  ;;  %v3374_v38 = vld [vmem:[#allocation10 + $0xe4] ss:$16 sps:$4 sm:$0xff]   ;;  %v3377_v39 = vld [vmem:[#allocation10 + $0xec] ss:$16 sps:$4 sm:$0xff]  }
 0x4ab   : > { %1554 = vmatprep.subr.bf16.mxu0 %v2977_v40  ;;  %1595 = vmatprep.subr.bf16.mxu1 %v2979_v41 }
 0x4ac   : > { %1584 = vmatprep.mubr.bf16.mxu0 %v3677_v21  ;;  %1625 = vmatprep.mubr.bf16.mxu1 %v3677_v21 }
 0x4ae   : > { %1555 = vmatpush1.bf16.msra.mxu0 %v2981_v42  ;;  %1596 = vmatpush1.bf16.msra.mxu1 %v2985_v43  ;;  %v3683_v42 = vld [vmem:[#allocation23_spill] sm:$0xff] }
 0x4af   : > { %1556 = vmatprep.subr.bf16.mxu0 %v2989_v44  ;;  %1597 = vmatprep.subr.bf16.mxu1 %v2991_v45 }
 0x4b2   : > { %1557 = vmatpush1.bf16.msra.mxu0 %v2996_v47  ;;  %1598 = vmatpush1.bf16.msra.mxu1 %v2998_v48  ;;  %v3684_v48 = vld [vmem:[#allocation25_spill] sm:$0xff] }
 0x4b3   : > { %1558 = vmatprep.subr.bf16.mxu0 %v3002_v49  ;;  %1599 = vmatprep.subr.bf16.mxu1 %v3006_v50 }
 0x4b6   : > { %1559 = vmatpush1.bf16.msra.mxu0 %v3008_v51  ;;  %1600 = vmatpush1.bf16.msra.mxu1 %v3010_v52 }
 0x4b7   : > { %1560 = vmatprep.subr.bf16.mxu0 %v3014_v53  ;;  %1601 = vmatprep.subr.bf16.mxu1 %v3018_v54 }
 0x4ba   : > { %1561 = vmatpush1.bf16.msra.mxu0 %v3025_v56  ;;  %1602 = vmatpush1.bf16.msra.mxu1 %v3027_v57  ;;  %v3685_v56 = vld [vmem:[#allocation26_spill] sm:$0xff] }
 0x4bb   : > { %1562 = vmatprep.subr.bf16.mxu0 %v3031_v58  ;;  %1603 = vmatprep.subr.bf16.mxu1 %v3033_v59  ;;  %v3686_v58 = vld [vmem:[#allocation24_spill] sm:$0xff] }
 0x4be   : > { %1563 = vmatpush1.bf16.msra.mxu0 %v3037_v60  ;;  %1604 = vmatpush1.bf16.msra.mxu1 %v3039_v61 }
 0x4bf   : > { %1564 = vmatprep.subr.bf16.mxu0 %v3043_v62  ;;  %1605 = vmatprep.subr.bf16.mxu1 %v3045_v63 }
 0x4c2   : > { %1565 = vmatpush1.bf16.msra.mxu0 %v3052_v1  ;;  %1606 = vmatpush1.bf16.msra.mxu1 %v3054_v2 }
 0x4c3   : > { %1566 = vmatprep.subr.bf16.mxu0 %v3058_v3  ;;  %1607 = vmatprep.subr.bf16.mxu1 %v3060_v5 }
 0x4c6   : > { %1567 = vmatpush1.bf16.msra.mxu0 %v3064_v6  ;;  %1608 = vmatpush1.bf16.msra.mxu1 %v3066_v7 }
 0x4c7   : > { %1676 = vmatprep.subr.bf16.mxu0 %v3374_v38  ;;  %1717 = vmatprep.subr.bf16.mxu1 %v3377_v39 }
 0x569   : > { %v1462_v40 = vpop.f32.mrf.mxu0  ;;  %v1503_v41 = vpop.f32.mrf.mxu1 }
 0x56a   : > { %v1510_v43 = vadd.f32 %v1462_v40, %v3683_v42  ;;  %v1512_v59 = vadd.f32 %v1503_v41, %v3686_v58  ;;  %v3462_v40 = vld [vmem:[#allocation10 + $0x2c] ss:$16 sps:$4 sm:$0xff]   ;;  %v3465_v41 = vld [vmem:[#allocation10 + $0x20] ss:$16 sps:$4 sm:$0xff]   ;;  %v3468_v42 = vld [vmem:[#allocation10 + $0x28] ss:$16 sps:$4 sm:$0xff]  }
 0x56b   : > { %v1464_v44 = vpop.f32.mrf.mxu0  ;;  %v1505_v45 = vpop.f32.mrf.mxu1 }
 0x56c   : > { %v2194_v47 = vmul.f32 -1.442695, %v1510_v43  ;;  %v1511_v49 = vadd.f32 %v1464_v44, %v3684_v48  ;;  %v1513_v57 = vadd.f32 %v1505_v45, %v3685_v56  ;;  %v3471_v43 = vld [vmem:[#allocation10 + $0x4] ss:$16 sps:$4 sm:$0xff]   ;;  %v3474_v44 = vld [vmem:[#allocation10 + $0xc] ss:$16 sps:$4 sm:$0xff]  }
 0x56d   : > { %v1466_v50 = vpop.f32.mrf.mxu0  ;;  %v1507_v51 = vpop.f32.mrf.mxu1  ;;  %v3477_v45 = vld [vmem:[#allocation10] ss:$16 sps:$4 sm:$0xff]   ;;  %v3688_v56 = vld [vmem:[#allocation29_spill] sm:$0xff] }
 0x56e   : > { %2486 = vpow2.f32 %v2194_v47  ;;  %v2195_v52 = vmul.f32 -1.442695, %v1511_v49  ;;  %v2196_v60 = vmul.f32 -1.442695, %v1513_v57  ;;  %v3480_v47 = vld [vmem:[#allocation10 + $0x8] ss:$16 sps:$4 sm:$0xff]  }
 0x56f   : > { %v1467_v53 = vpop.f32.mrf.mxu0  ;;  %v1508_v54 = vpop.f32.mrf.mxu1  ;;  %v3687_v50 = vld [vmem:[#allocation27_spill] sm:$0xff] }
 0x570   : > { %2488 = vpow2.f32 %v2195_v52 }
 0x571   : > { %2490 = vtanh.f32 %v1512_v59 }
 0x572   : > { %2492 = vpow2.f32 %v2196_v60 }
 0x57b   : > { %v2487_v61 = vpop.eup %2486 }
 0x57c   : > { %v1517_v62 = vadd.f32 1.0, %v2487_v61 }
 0x57d   : > { %v2489_v63 = vpop.eup %2488 }
 0x57e   : > { %2494 = vrcp.f32 %v1517_v62  ;;  %v1523_v1 = vadd.f32 1.0, %v2489_v63  ;;  %v2491_v2 = vpop.eup %2490  ;;  %v3689_v63 = vld [vmem:[#allocation30_spill] sm:$0xff] }
 0x57f   : > { %v2493_v3 = vpop.eup %2492 }
 0x580   : > { %2496 = vrcp.f32 %v1523_v1  ;;  %v1530_v13 = vadd.f32 1.0, %v2493_v3  ;;  %v3690_v1 = vld [vmem:[#allocation28_spill] sm:$0xff] }
 0x582   : > { %2498 = vrcp.f32 %v1530_v13 }
 0x58b   : > { %v2495_v5 = vpop.eup %2494 }
 0x58c   : > { %v1534_v6 = vmul.f32 %v2495_v5, %v2491_v2 }
 0x58d   : > { %v2497_v7 = vpop.eup %2496 }
 0x58e   : > { %v1533_v4 = vmul.f32 %v2497_v7, %v3336_v27  ;;  %v3444_v27 = vld [vmem:[#allocation10 + $0x68] ss:$16 sps:$4 sm:$0xff]  }
 0x58f   : > { %v2499_v30 = vpop.eup %2498 }
 0x590   : > { %v3385_v26 = vadd.f32 %v1534_v6, %v1533_v4 }
 0x592   : > { %2500 = vtanh.f32 %v3385_v26  ;;  %2198 = vst [vmem:[%s2961_s17 + $0x20] sm:$0xff] %v3385_v26 }
 0x59f   : > { %v2501_v10 = vpop.eup %2500 }
 0x5a0   : > { %v1537_v14 = vmul.f32 %v2501_v10, %v2499_v30 }
 0x5a2   : > { %v1538_v12 = vpack.c.bf16 %v1537_v14, %v1537_v14  ;;  %2197 = vst [vmem:[%s2959_s15 + $0x20] sm:$0xff] %v1537_v14 }
 0x5a4   : > { %1539 = vst [vmem:[#allocation3] sm:$0xf] %v1538_v12 }
 0x5ab   : > { %v1545_v15 = vld [vmem:[#allocation3] sm:$0xf] }
 0x5ac   : > { %1585 = vmatmul.mubr.bf16.vlgmr.msra.gmra.mxu0 %v1545_v15  ;;  %1626 = vmatmul.mubr.bf16.vlgmr.msra.gmra.mxu1 %v1545_v15 }
 0x5ad   : > { %1677 = vmatpush1.bf16.msra.mxu0 %v3391_v28  ;;  %1718 = vmatpush1.bf16.msra.mxu1 %v3394_v34 }
 0x5ae   : > { %1678 = vmatprep.subr.bf16.mxu0 %v3397_v35  ;;  %1719 = vmatprep.subr.bf16.mxu1 %v3400_v0 }
 0x5af   : > { %1708 = vmatprep.mubr.bf16.mxu0 %v3677_v21  ;;  %1749 = vmatprep.mubr.bf16.mxu1 %v3677_v21 }
 0x5b1   : > { %1679 = vmatpush1.bf16.msra.mxu0 %v3405_v36  ;;  %1720 = vmatpush1.bf16.msra.mxu1 %v3408_v19 }
 0x5b2   : > { %1680 = vmatprep.subr.bf16.mxu0 %v3411_v31  ;;  %1721 = vmatprep.subr.bf16.mxu1 %v3414_v32 }
 0x5b5   : > { %1681 = vmatpush1.bf16.msra.mxu0 %v3417_v25  ;;  %1722 = vmatpush1.bf16.msra.mxu1 %v3420_v55 }
 0x5b6   : > { %1682 = vmatprep.subr.bf16.mxu0 %v3423_v9  ;;  %1723 = vmatprep.subr.bf16.mxu1 %v3426_v8 }
 0x5b9   : > { %1683 = vmatpush1.bf16.msra.mxu0 %v3429_v17  ;;  %1724 = vmatpush1.bf16.msra.mxu1 %v3432_v23 }
 0x5ba   : > { %1684 = vmatprep.subr.bf16.mxu0 %v3435_v37  ;;  %1725 = vmatprep.subr.bf16.mxu1 %v3438_v11 }
 0x5bd   : > { %1685 = vmatpush1.bf16.msra.mxu0 %v3441_v18  ;;  %1726 = vmatpush1.bf16.msra.mxu1 %v3444_v27 }
 0x5be   : > { %1686 = vmatprep.subr.bf16.mxu0 %v3447_v20  ;;  %1727 = vmatprep.subr.bf16.mxu1 %v3450_v22 }
 0x5c1   : > { %1687 = vmatpush1.bf16.msra.mxu0 %v3453_v29  ;;  %1728 = vmatpush1.bf16.msra.mxu1 %v3456_v24 }
 0x5c2   : > { %1688 = vmatprep.subr.bf16.mxu0 %v3459_v16  ;;  %1729 = vmatprep.subr.bf16.mxu1 %v3462_v40 }
 0x5c5   : > { %1689 = vmatpush1.bf16.msra.mxu0 %v3465_v41  ;;  %1730 = vmatpush1.bf16.msra.mxu1 %v3468_v42 }
 0x5c6   : > { %1690 = vmatprep.subr.bf16.mxu0 %v3471_v43  ;;  %1731 = vmatprep.subr.bf16.mxu1 %v3474_v44 }
 0x5c9   : > { %1691 = vmatpush1.bf16.msra.mxu0 %v3477_v45  ;;  %1732 = vmatpush1.bf16.msra.mxu1 %v3480_v47 }
 0x5ca   : > { %1800 = vmatprep.subr.bf16.mxu0 %v3374_v38  ;;  %1841 = vmatprep.subr.bf16.mxu1 %v3377_v39 }
 0x66c   : > { %v1586_v48 = vpop.f32.mrf.mxu0  ;;  %v1627_v49 = vpop.f32.mrf.mxu1 }
 0x66d   : > { %v1634_v51 = vadd.f32 %v1586_v48, %v3687_v50  ;;  %v1636_v39 = vadd.f32 %v1627_v49, %v3690_v1 }
 0x66e   : > { %v1588_v52 = vpop.f32.mrf.mxu0  ;;  %v1629_v53 = vpop.f32.mrf.mxu1 }
 0x66f   : > { %v2199_v54 = vmul.f32 -1.442695, %v1634_v51  ;;  %v1635_v57 = vadd.f32 %v1588_v52, %v3688_v56  ;;  %v1637_v38 = vadd.f32 %v1629_v53, %v3689_v63 }
 0x670   : > { %v1590_v58 = vpop.f32.mrf.mxu0  ;;  %v1631_v59 = vpop.f32.mrf.mxu1 }
 0x671   : > { %2502 = vpow2.f32 %v2199_v54  ;;  %v2200_v60 = vmul.f32 -1.442695, %v1635_v57  ;;  %v2201_v2 = vmul.f32 -1.442695, %v1637_v38 }
 0x672   : > { %v1591_v61 = vpop.f32.mrf.mxu0  ;;  %v1632_v62 = vpop.f32.mrf.mxu1 }
 0x673   : > { %2504 = vpow2.f32 %v2200_v60  ;;  %v3695_v61 = vld [vmem:[#allocation35_spill] sm:$0xff] }
 0x674   : > { %2506 = vtanh.f32 %v1636_v39 }
 0x675   : > { %2508 = vpow2.f32 %v2201_v2 }
 0x67e   : > { %v2503_v3 = vpop.eup %2502 }
 0x67f   : > { %v1641_v5 = vadd.f32 1.0, %v2503_v3 }
 0x680   : > { %v2505_v6 = vpop.eup %2504 }
 0x681   : > { %2510 = vrcp.f32 %v1641_v5  ;;  %v1647_v7 = vadd.f32 1.0, %v2505_v6  ;;  %v2507_v13 = vpop.eup %2506 }
 0x682   : > { %v2509_v4 = vpop.eup %2508 }
 0x683   : > { %2512 = vrcp.f32 %v1647_v7  ;;  %v1654_v12 = vadd.f32 1.0, %v2509_v4  ;;  %v3696_v4 = vld [vmem:[#allocation36_spill] sm:$0xff] }
 0x685   : > { %2514 = vrcp.f32 %v1654_v12 }
 0x68e   : > { %v2511_v30 = vpop.eup %2510 }
 0x68f   : > { %v1658_v10 = vmul.f32 %v2511_v30, %v2507_v13 }
 0x690   : > { %v2513_v14 = vpop.eup %2512 }
 0x691   : > { %v1657_v15 = vmul.f32 %v2513_v14, %v3385_v26 }
 0x692   : > { %v2515_v49 = vpop.eup %2514 }
 0x693   : > { %v3490_v48 = vadd.f32 %v1658_v10, %v1657_v15 }
 0x695   : > { %2516 = vtanh.f32 %v3490_v48  ;;  %2203 = vst [vmem:[%s2961_s17 + $0x28] sm:$0xff] %v3490_v48 }
 0x6a2   : > { %v2517_v50 = vpop.eup %2516 }
 0x6a3   : > { %v1661_v51 = vmul.f32 %v2517_v50, %v2515_v49 }
 0x6a5   : > { %v1662_v52 = vpack.c.bf16 %v1661_v51, %v1661_v51  ;;  %2202 = vst [vmem:[%s2959_s15 + $0x28] sm:$0xff] %v1661_v51 }
 0x6a7   : > { %1663 = vst [vmem:[#allocation3] sm:$0xf] %v1662_v52 }
 0x6ae   : > { %v1669_v53 = vld [vmem:[#allocation3] sm:$0xf] }
 0x6af   : > { %1709 = vmatmul.mubr.bf16.vlgmr.msra.gmra.mxu0 %v1669_v53  ;;  %1750 = vmatmul.mubr.bf16.vlgmr.msra.gmra.mxu1 %v1669_v53 }
 0x6b0   : > { %1801 = vmatpush1.bf16.msra.mxu0 %v3391_v28  ;;  %1842 = vmatpush1.bf16.msra.mxu1 %v3394_v34  ;;  %v3691_v28 = vld [vmem:[#allocation31_spill] sm:$0xff] }
 0x6b1   : > { %1802 = vmatprep.subr.bf16.mxu0 %v3397_v35  ;;  %1843 = vmatprep.subr.bf16.mxu1 %v3400_v0 }
 0x6b2   : > { %1832 = vmatprep.mubr.bf16.mxu0 %v3677_v21  ;;  %1873 = vmatprep.mubr.bf16.mxu1 %v3677_v21 }
 0x6b4   : > { %1803 = vmatpush1.bf16.msra.mxu0 %v3405_v36  ;;  %1844 = vmatpush1.bf16.msra.mxu1 %v3408_v19  ;;  %v3692_v19 = vld [vmem:[#allocation33_spill] sm:$0xff] }
 0x6b5   : > { %1804 = vmatprep.subr.bf16.mxu0 %v3411_v31  ;;  %1845 = vmatprep.subr.bf16.mxu1 %v3414_v32 }
 0x6b8   : > { %1805 = vmatpush1.bf16.msra.mxu0 %v3417_v25  ;;  %1846 = vmatpush1.bf16.msra.mxu1 %v3420_v55 }
 0x6b9   : > { %1806 = vmatprep.subr.bf16.mxu0 %v3423_v9  ;;  %1847 = vmatprep.subr.bf16.mxu1 %v3426_v8 }
 0x6bc   : > { %1807 = vmatpush1.bf16.msra.mxu0 %v3429_v17  ;;  %1848 = vmatpush1.bf16.msra.mxu1 %v3432_v23  ;;  %v3693_v17 = vld [vmem:[#allocation34_spill] sm:$0xff] }
 0x6bd   : > { %1808 = vmatprep.subr.bf16.mxu0 %v3435_v37  ;;  %1849 = vmatprep.subr.bf16.mxu1 %v3438_v11  ;;  %v3694_v37 = vld [vmem:[#allocation32_spill] sm:$0xff] }
 0x6c0   : > { %1809 = vmatpush1.bf16.msra.mxu0 %v3441_v18  ;;  %1850 = vmatpush1.bf16.msra.mxu1 %v3444_v27 }
 0x6c1   : > { %1810 = vmatprep.subr.bf16.mxu0 %v3447_v20  ;;  %1851 = vmatprep.subr.bf16.mxu1 %v3450_v22 }
 0x6c4   : > { %1811 = vmatpush1.bf16.msra.mxu0 %v3453_v29  ;;  %1852 = vmatpush1.bf16.msra.mxu1 %v3456_v24 }
 0x6c5   : > { %1812 = vmatprep.subr.bf16.mxu0 %v3459_v16  ;;  %1853 = vmatprep.subr.bf16.mxu1 %v3462_v40 }
 0x6c8   : > { %1813 = vmatpush1.bf16.msra.mxu0 %v3465_v41  ;;  %1854 = vmatpush1.bf16.msra.mxu1 %v3468_v42 }
 0x6c9   : > { %1814 = vmatprep.subr.bf16.mxu0 %v3471_v43  ;;  %1855 = vmatprep.subr.bf16.mxu1 %v3474_v44 }
 0x6cc   : > { %1815 = vmatpush1.bf16.msra.mxu0 %v3477_v45  ;;  %1856 = vmatpush1.bf16.msra.mxu1 %v3480_v47 }
 0x76f   : > { %v1710_v21 = vpop.f32.mrf.mxu0  ;;  %v1751_v26 = vpop.f32.mrf.mxu1 }
 0x770   : > { %v1758_v34 = vadd.f32 %v1710_v21, %v3691_v28  ;;  %v1760_v11 = vadd.f32 %v1751_v26, %v3694_v37 }
 0x771   : > { %v1712_v35 = vpop.f32.mrf.mxu0  ;;  %v1753_v0 = vpop.f32.mrf.mxu1 }
 0x772   : > { %v2204_v36 = vmul.f32 -1.442695, %v1758_v34  ;;  %v1759_v31 = vadd.f32 %v1712_v35, %v3692_v19  ;;  %v1761_v23 = vadd.f32 %v1753_v0, %v3693_v17 }
 0x773   : > { %v1714_v32 = vpop.f32.mrf.mxu0  ;;  %v1755_v25 = vpop.f32.mrf.mxu1 }
 0x774   : > { %2518 = vpow2.f32 %v2204_v36  ;;  %v2205_v55 = vmul.f32 -1.442695, %v1759_v31  ;;  %v2206_v18 = vmul.f32 -1.442695, %v1761_v23 }
 0x775   : > { %v1715_v9 = vpop.f32.mrf.mxu0  ;;  %v1756_v8 = vpop.f32.mrf.mxu1 }
 0x776   : > { %2520 = vpow2.f32 %v2205_v55 }
 0x777   : > { %2522 = vtanh.f32 %v1760_v11 }
 0x778   : > { %2524 = vpow2.f32 %v2206_v18 }
 0x781   : > { %v2519_v27 = vpop.eup %2518 }
 0x782   : > { %v1765_v20 = vadd.f32 1.0, %v2519_v27 }
 0x783   : > { %v2521_v22 = vpop.eup %2520 }
 0x784   : > { %2526 = vrcp.f32 %v1765_v20  ;;  %v1771_v29 = vadd.f32 1.0, %v2521_v22  ;;  %v2523_v24 = vpop.eup %2522 }
 0x785   : > { %v2525_v16 = vpop.eup %2524 }
 0x786   : > { %2528 = vrcp.f32 %v1771_v29  ;;  %v1778_v43 = vadd.f32 1.0, %v2525_v16 }
 0x788   : > { %2530 = vrcp.f32 %v1778_v43 }
 0x791   : > { %v2527_v40 = vpop.eup %2526 }
 0x792   : > { %v1782_v41 = vmul.f32 %v2527_v40, %v2523_v24 }
 0x793   : > { %v2529_v42 = vpop.eup %2528 }
 0x794   : > { %v1781_v44 = vmul.f32 %v2529_v42, %v3490_v48 }
 0x795   : > { %v2531_v47 = vpop.eup %2530 }
 0x796   : > { %v1783_v45 = vadd.f32 %v1782_v41, %v1781_v44 }
 0x798   : > { %2532 = vtanh.f32 %v1783_v45  ;;  %2208 = vst [vmem:[%s2961_s17 + $0x30] sm:$0xff] %v1783_v45 }
 0x7a5   : > { %v2533_v54 = vpop.eup %2532 }
 0x7a6   : > { %v1785_v56 = vmul.f32 %v2533_v54, %v2531_v47 }
 0x7a8   : > { %v1786_v57 = vpack.c.bf16 %v1785_v56, %v1785_v56  ;;  %2207 = vst [vmem:[%s2959_s15 + $0x30] sm:$0xff] %v1785_v56 }
 0x7aa   : > { %1787 = vst [vmem:[#allocation3] sm:$0xf] %v1786_v57 }
 0x7b1   : > { %v1793_v58 = vld [vmem:[#allocation3] sm:$0xf] }
 0x7b2   : > { %1833 = vmatmul.mubr.bf16.vlgmr.msra.gmra.mxu0 %v1793_v58  ;;  %1874 = vmatmul.mubr.bf16.vlgmr.msra.gmra.mxu1 %v1793_v58 }
 0x872   : > { %v1834_v59 = vpop.f32.mrf.mxu0  ;;  %v1875_v60 = vpop.f32.mrf.mxu1 }
 0x873   : > { %v1882_v62 = vadd.f32 %v1834_v59, %v3695_v61  ;;  %v1884_v30 = vadd.f32 %v1875_v60, %v3696_v4 }
 0x874   : > { %v1836_v63 = vpop.f32.mrf.mxu0  ;;  %v1877_v38 = vpop.f32.mrf.mxu1 }
 0x875   : > { %v2209_v1 = vmul.f32 -1.442695, %v1882_v62  ;;  %v1883_v39 = vadd.f32 %v1836_v63, %v3191_v33  ;;  %v1885_v13 = vadd.f32 %v1877_v38, %v3194_v46 }
 0x876   : > { %v1838_v2 = vpop.f32.mrf.mxu0  ;;  %v1879_v3 = vpop.f32.mrf.mxu1 }
 0x877   : > { %2534 = vpow2.f32 %v2209_v1  ;;  %v2210_v5 = vmul.f32 -1.442695, %v1883_v39  ;;  %v2211_v10 = vmul.f32 -1.442695, %v1885_v13 }
 0x878   : > { %v1839_v6 = vpop.f32.mrf.mxu0  ;;  %v1880_v7 = vpop.f32.mrf.mxu1 }
 0x879   : > { %2536 = vpow2.f32 %v2210_v5 }
 0x87a   : > { %2538 = vtanh.f32 %v1884_v30 }
 0x87b   : > { %2540 = vpow2.f32 %v2211_v10 }
 0x884   : > { %v2535_v14 = vpop.eup %2534 }
 0x885   : > { %v1889_v12 = vadd.f32 1.0, %v2535_v14 }
 0x886   : > { %v2537_v15 = vpop.eup %2536 }
 0x887   : > { %2542 = vrcp.f32 %v1889_v12  ;;  %v1895_v33 = vadd.f32 1.0, %v2537_v15  ;;  %v2539_v48 = vpop.eup %2538 }
 0x888   : > { %v2541_v49 = vpop.eup %2540 }
 0x889   : > { %2544 = vrcp.f32 %v1895_v33  ;;  %v1902_v52 = vadd.f32 1.0, %v2541_v49 }
 0x88b   : > { %2546 = vrcp.f32 %v1902_v52 }
 0x894   : > { %v2543_v50 = vpop.eup %2542 }
 0x895   : > { %v1906_v46 = vmul.f32 %v2543_v50, %v2539_v48 }
 0x896   : > { %v2545_v51 = vpop.eup %2544 }
 0x897   : > { %v1905_v53 = vmul.f32 %v2545_v51, %v1783_v45 }
 0x899   : > { %v1907_v21 = vadd.f32 %v1906_v46, %v1905_v53 }
 0x89b   : > { %2548 = vtanh.f32 %v1907_v21  ;;  %1912 = vst [vmem:[#allocation4] sm:$0xff] %v1907_v21  ;;  %2213 = vst [vmem:[%s2961_s17 + $0x38] sm:$0xff] %v1907_v21 }
 0x89c   : > { %2675 = shalt.err (!%p2672_p10)
}
 0x89d   : > { %s2676_s30 = scalar_lea.hbm %s3546_s11, 1024  ;;  %s2680_s28 = scalar_lea.hbm %s3640_s5, 2048 }
 0x89e   : > { %p2677_p1 = scmp.ne.s32.totalorder %s3546_s11, %s2676_s30  ;;  %p2681_p12 = scmp.lt.s32.totalorder %s3546_s11, %s3640_s5 }
 0x89f   : > { %p2682_p3 = scmp.lt.s32.totalorder %s2680_s28, %s2676_s30 }
 0x8a0   : > { %p2678_p4 = pnand %p2677_p1, %p2917_p7 }
 0x8a1   : > { %p2683_p8 = por %p2682_p3, %p2681_p12 }
 0x8a2   : > { %p2679_p6 = pneg %p2678_p4 }
 0x8a4   : > { %p2684_p9 = pnand %p2683_p8, %p2679_p6 }
 0x8a6   : > { %2687 = shalt.err (!%p2684_p9)
}
 0x8a7   : > { %s2789_s13 = smov 128   ;;  %s2790_s14 = smov 8   ;;  %v2547_v26 = vpop.eup %2546 }
 0x8a8   : > { %2236 = dma.vmem_to_hbm [thread:$0]  (%p2917_p7), %s3548_s24, 1024, %s3546_s11, %s1923_s10, %s2789_s13, %s2789_s13, %s2790_s14   ;;  %v2549_v28 = vpop.eup %2548 }
 0x8a9   : > { %s1937_s1 = sshll.u32 %s2959_s15, 4  ;;  %v1909_v34 = vmul.f32 %v2549_v28, %v2547_v26  ;;  %s3583_s17 = scalar_lea.hbm %s3639_s4, %s2223_s27  ;;  %s3585_s1 = int_to_ptr.vmem [resolvable:$true] %s1937_s1 }
 0x8aa   : > { %s1918_s26 = scalar_lea.sflag [#allocation7], %s2944_s9  ;;  %s2688_s28 = scalar_lea.vmem %s3585_s1, 1024 }
 0x8ab   : > { %v1910_v35 = vpack.c.bf16 %v1909_v34, %v1909_v34  ;;  %2212 = vst [vmem:[%s2959_s15 + $0x38] sm:$0xff] %v1909_v34  ;;  %p2689_p11 = scmp.ne.s32.totalorder %s3585_s1, %s2688_s28  ;;  %s2791_s24 = smov [#allocation11]  }
 0x8ac   : > { %s2692_s21 = sshll.u32 %s2791_s24, 4  ;;  %s2693_s21 = int_to_ptr.vmem [resolvable:$false] %s2692_s21 }
 0x8ad   : > { %p2690_p2 = pnand %p2689_p11, %p2917_p7  ;;  %s2694_s11 = scalar_lea.vmem %s2693_s21, 2048 }
 0x8ae   : > { %p2695_p0 = scmp.lt.s32.totalorder %s3585_s1, %s2693_s21  ;;  %p2696_p5 = scmp.lt.s32.totalorder %s2694_s11, %s2688_s28 }
 0x8af   : > { %p2691_p13 = pneg %p2690_p2 }
 0x8b0   : > { %p2697_p10 = por %p2696_p5, %p2695_p0 }
 0x8b2   : > { %p2698_p1 = pnand %p2697_p10, %p2691_p13 }
 0x8b4   : > { %2701 = shalt.err (!%p2698_p1)
}
 0x8b5   : > { %s2702_s15 = scalar_lea.hbm %s3583_s17, 1024  ;;  %s2706_s10 = scalar_lea.hbm %s3639_s4, 2048 }
 0x8b6   : > { %p2703_p4 = scmp.ne.s32.totalorder %s3583_s17, %s2702_s15  ;;  %p2707_p3 = scmp.lt.s32.totalorder %s3583_s17, %s3639_s4 }
 0x8b7   : > { %p2708_p8 = scmp.lt.s32.totalorder %s2706_s10, %s2702_s15 }
 0x8b8   : > { %p2704_p6 = pnand %p2703_p4, %p2917_p7 }
 0x8b9   : > { %p2709_p9 = por %p2708_p8, %p2707_p3 }
 0x8ba   : > { %p2705_p12 = pneg %p2704_p6 }
 0x8bc   : > { %p2710_p11 = pnand %p2709_p9, %p2705_p12 }
 0x8be   : > { %2713 = shalt.err (!%p2710_p11)
}
 0x8bf   : > { %2235 = dma.vmem_to_hbm [thread:$0]  (%p2917_p7), %s3585_s1, 1024, %s3583_s17, %s1918_s26, %s2789_s13, %s2789_s13, %s2790_s14   ;;  %1911 = vst [vmem:[#allocation3] sm:$0xf] %v1910_v35 }
 0x8c0 PF: > { %s1969_s16 = sand.u32 1, %s2756_s18   ;;  %p3697_p2 = scmp.ne.s32.totalorder %s3650_s29, 0 }
 0x8c1   : > { %p3698_p13 = scmp.ge.s32.totalorder %s2776_s23, 2  ;;  %s1970_s30 = scalar_lea.sflag [#allocation7], %s1969_s16 }
 0x8c3   : > { %p2251_p0 = pnand %p3698_p13, %p3697_p2 }
 0x8c5   : > { %p2252_p5 = pneg %p2251_p0 }
 0x8c7   : > { %2747 = dma.done.wait (%p2252_p5), %s1970_s30, 1024  }
 0x8c8   : > { %2749 = vsyncadd (%p2252_p5), %s1970_s30, 4294966272  ;;  %s1979_s7 = scalar_lea.sflag [#allocation13], %s1969_s16 }
 0x8c9   : > { %2751 = dma.done.wait (%p2252_p5), %s1979_s7, 1024  }
 0x8ca   : > { %2753 = vsyncadd (%p2252_p5), %s1979_s7, 4294966272  ;;  %s26_s23 = sadd.s32 1, %s2776_s23   ;;  %s3699_s18 = smov %s2760_s19 }
 0x8cb   : > { %p23_p10 = scmp.ge.s32.totalorder %s26_s23, 4   ;;  %s3700_s19 = smov %s2764_s20 }
 0x8cc   : > { %s3701_s20 = smov %s2926_s12  ;;  %s3702_s21 = smov %s2772_s22 }
 0x8cd   : > { %s3703_s22 = smov %s3705_s25  ;;  %25 = sbr.rel (!%p23_p10) target bundleno = 11 (0xb), region = 131 }
 0x8d2   :  { %1984 = vsyncpa [#allocation6], 1 }
 0x8d3   :  { %1986 = vsyncpa [#allocation6 + $0x1], 1 }
 0x8d4   :  { %1987 = vsyncpa [#allocation9], 1 }
 0x8d5   :  { %1988 = vsyncpa [#allocation7], 1 }
 0x8d6   :  { %1990 = vsyncpa [#allocation7 + $0x1], 1 }
 0x8d7   :  { %1991 = vsyncpa [#allocation13], 1 }
 0x8d8   :  { %1993 = vsyncpa [#allocation13 + $0x1], 1 }

</bundles_post_ra>
